<compile_context>
chip_gen: v7x
topology: tpu7x:2x2x1
jax: 0.10.0
libtpu: 0.0.40
codegen_flags: <defaults>
</compile_context>

<pallas_src>
import numpy as np

import jax
import jax.numpy as jnp
from jax.experimental import pallas as pl
from jax.experimental.pallas import tpu as pltpu


# ---------------------------------------------------------------------------
# In-kernel helpers (all operate on lane-packed (N*H, W*C) f32 slabs in VMEM)
# ---------------------------------------------------------------------------

def _row_in_image(rows, lanes, h_img):
    """int32 (rows, lanes) array holding (row index % h_img)."""
    r = jax.lax.broadcasted_iota(jnp.int32, (rows, lanes), 0)
    if h_img & (h_img - 1) == 0:                       # power of two -> bit-and
        return jnp.bitwise_and(r, h_img - 1)
    return jnp.remainder(r, h_img)


def _conv3x3_packed(x, t_ref, b_ref, h_img):
    """3x3 'same' conv as 3 accumulated lane-dense MXU matmuls.

    x:     (N*H, W_lanes*Cin) slab value.
    t_ref: (3, W_lanes*Cin, W*Cout) block-Toeplitz weights (one per kh tap,
           built host-side; W-direction taps and any maxpool stride are folded
           into the rows).
    b_ref: (1, W*Cout) lane-tiled bias.
    """
    rows, lanes = x.shape
    h = _row_in_image(rows, lanes, h_img)
    z = jnp.zeros((1, lanes), x.dtype)
    # Row-shifted copies (x[h-1], x[h+1]) with zeros at each image's H edges.
    x_m1 = jnp.where(h == 0, 0.0, jnp.concatenate([z, x[:-1, :]], axis=0))
    x_p1 = jnp.where(h == h_img - 1, 0.0,
                     jnp.concatenate([x[1:, :], z], axis=0))
    acc = jnp.dot(x_m1, t_ref[0], preferred_element_type=jnp.float32)
    acc = acc + jnp.dot(x, t_ref[1], preferred_element_type=jnp.float32)
    acc = acc + jnp.dot(x_p1, t_ref[2], preferred_element_type=jnp.float32)
    return acc + b_ref[...]


def _lane_group_allsum(v, w_dim, c):
    """v: (1, w_dim*c).  Returns per-channel sum over the w_dim lane groups,
    broadcast back to every lane (circular lane-roll reduction tree)."""
    wc = w_dim * c
    if w_dim & (w_dim - 1) == 0:                       # power of two -> log tree
        step = c
        while step < wc:
            v = v + pltpu.roll(v, shift=step, axis=1)
            step *= 2
        return v
    acc = v
    for i in range(1, w_dim):
        acc = acc + pltpu.roll(v, shift=i * c, axis=1)
    return acc


def _relu_bn_packed(x, gamma_p, beta_p, w_dim, c, count):
    """ReLU then training-mode BatchNorm (batch stats, biased variance) on a
    lane-packed slab.  gamma_p / beta_p are (1, w_dim*c) lane-tiled params."""
    xr = jnp.maximum(x, 0.0)
    s1 = _lane_group_allsum(jnp.sum(xr, axis=0, keepdims=True), w_dim, c)
    s2 = _lane_group_allsum(jnp.sum(xr * xr, axis=0, keepdims=True), w_dim, c)
    inv_n = 1.0 / count
    mean = s1 * inv_n
    var = jnp.maximum(s2 * inv_n - mean * mean, 0.0)   # clamp: no rsqrt(<0)
    scale = jax.lax.rsqrt(var + 1e-5) * gamma_p
    shift = beta_p - mean * scale
    return xr * scale + shift


# ---------------------------------------------------------------------------
# Fused whole-network kernel (generated per static configuration)
# ---------------------------------------------------------------------------

def make_cnn_kernel(batch, cin0, h0, w0, blocks_cfg, num_fc, h_f, fc_chunk):
    """Ref order: x_nchw,
                  [T1(3,K,L), b1p, T2(3,K,L), b2p, gamma_p, beta_p] * n_blocks,
                  [w, b] * num_fc,
                  out, [pool scratch]*n_pool, flatten scratch."""
    n_blocks = len(blocks_cfg)

    def kernel(*refs):
        idx = 0
        x4 = refs[idx][...]
        idx += 1
        blk_refs = [refs[idx + 6 * b: idx + 6 * (b + 1)] for b in range(n_blocks)]
        idx += 6 * n_blocks
        fc_refs = [refs[idx + 2 * l: idx + 2 * (l + 1)] for l in range(num_fc)]
        idx += 2 * num_fc
        out_ref = refs[idx]
        scratch = list(refs[idx + 1:])

        # NCHW -> lane-packed (N*H, Cin*W) slab, built in VMEM (no host-side
        # transpose; the first conv's Toeplitz rows use the same (ci, w) order).
        chans = [x4[:, ci, :, :].reshape(batch * h0, w0) for ci in range(cin0)]
        x = jnp.concatenate(chans, axis=-1)

        si = 0
        for b, cfg in enumerate(blocks_cfg):
            t1, b1, t2, b2, gp, bp = blk_refs[b]
            h_img, w_dim, cout = cfg["h"], cfg["w"], cfg["c"]
            # TODO(synk): F.dropout before conv_1 is a no-op (dropout_prob = 0).
            x = _conv3x3_packed(x, t1, b1, h_img)
            x = _conv3x3_packed(x, t2, b2, h_img)
            x = _relu_bn_packed(x, gp[...], bp[...], w_dim, cout,
                                float(batch * h_img * w_dim))
            if cfg["pool"]:
                scr = scratch[si]
                si += 1
                scr[...] = x
                half = batch * h_img // 2
                mh = jnp.maximum(scr[pl.ds(0, half, stride=2), :],
                                 scr[pl.ds(1, half, stride=2), :])
                # W-direction pair max; result stays at full lane width with
                # the pooled values in even-w lane groups (the stride-2 lane
                # selection is folded into the next layer's weight rows).
                x = jnp.maximum(
                    mh, pltpu.roll(mh, shift=w_dim * cout - cout, axis=1))

        # Flatten + FC-1: per-h strided row gather from a VMEM scratch,
        # contracted against the matching row chunk of the pre-permuted FC-1
        # weight -- no in-kernel reshape / transpose of the activation.
        fscr = scratch[si]
        fscr[...] = x
        w1_ref, b1_ref = fc_refs[0]
        f1 = w1_ref.shape[1]
        # TODO(synk): F.dropout before each FC layer is a no-op (dropout_prob = 0).
        acc = jnp.zeros((batch, f1), jnp.float32)
        for h in range(h_f):
            rows = fscr[pl.ds(h, batch, stride=h_f), :]        # (batch, chunk)
            wch = w1_ref[h * fc_chunk:(h + 1) * fc_chunk, :]   # (chunk, f1)
            acc = acc + jnp.dot(rows, wch, preferred_element_type=jnp.float32)
        hact = acc + b1_ref[...]
        if num_fc > 1:
            hact = jnp.maximum(hact, 0.0)
        for l in range(1, num_fc):
            w_ref, b_ref = fc_refs[l]
            hact = jnp.dot(hact, w_ref[...],
                           preferred_element_type=jnp.float32) + b_ref[...]
            if l < num_fc - 1:
                hact = jnp.maximum(hact, 0.0)

        m = jnp.max(hact, axis=1, keepdims=True)
        y = hact - m
        out_ref[...] = y - jnp.log(jnp.sum(jnp.exp(y), axis=1, keepdims=True))

    return kernel


# ---------------------------------------------------------------------------
# Host-side weight packing (done once, with numpy, outside jit)
# ---------------------------------------------------------------------------

def _toeplitz(w_hwio, width, in_stride, chan_major):
    """Block-Toeplitz per-kh weight matrices for a 3x3 'same' conv on a
    lane-packed slab.  w_hwio: (3, 3, Cin, Cout).
    Rows index input lanes; with in_stride == 2 the valid input w-groups sit at
    even lane groups (output of an un-compacted 2x2 maxpool); with chan_major
    the input lanes are ordered (ci, w) (raw NCHW input slab)."""
    _, _, cin, cout = w_hwio.shape
    w_lanes = width * in_stride
    t = np.zeros((3, w_lanes * cin, width * cout), np.float32)
    for kh in range(3):
        for wo in range(width):
            for kw in range(3):
                wi = wo + kw - 1
                if not 0 <= wi < width:
                    continue
                wl = wi * in_stride
                if chan_major:
                    for ci in range(cin):
                        t[kh, ci * w_lanes + wl,
                          wo * cout:(wo + 1) * cout] = w_hwio[kh, kw, ci, :]
                else:
                    t[kh, wl * cin:(wl + 1) * cin,
                      wo * cout:(wo + 1) * cout] = w_hwio[kh, kw, :, :]
    return t


def _pack_fc1(w_rows_nchw, c, h_f, w_f, in_stride):
    """Permute the first FC weight's rows from PyTorch's NCHW-flatten order to
    the kernel's per-h (w_lane, c) chunk layout (zero rows off the stride)."""
    f = w_rows_nchw.shape[1]
    w_lanes = w_f * in_stride
    out = np.zeros((h_f * w_lanes * c, f), np.float32)
    w4 = np.asarray(w_rows_nchw, np.float32).reshape(c, h_f, w_f, f)
    for h in range(h_f):
        for w in range(w_f):
            base = h * w_lanes * c + (w * in_stride) * c
            out[base:base + c, :] = w4[:, h, w, :]
    return out


def build_cnn_forward(input_shape, filter_list, maxpool_list, fc_list, batch):
    c0, h0, w0 = input_shape
    blocks_cfg, pack_cfg, scratch_shapes = [], [], []
    h_img, w_dim, stride_in = h0, w0, 1
    for i, cout in enumerate(filter_list):
        blocks_cfg.append(dict(h=h_img, w=w_dim, c=cout,
                               pool=bool(maxpool_list[i])))
        pack_cfg.append(dict(w=w_dim, stride=stride_in, chan_major=(i == 0)))
        if maxpool_list[i]:
            scratch_shapes.append(
                pltpu.VMEM((batch * h_img, w_dim * cout), jnp.float32))
            h_img //= 2
            w_dim //= 2
            stride_in = 2
        else:
            stride_in = 1
    c_f = filter_list[-1]
    h_f, w_f, stride_f = h_img, w_dim, stride_in
    fc_chunk = w_f * stride_f * c_f
    scratch_shapes.append(pltpu.VMEM((batch * h_f, fc_chunk), jnp.float32))

    kernel = make_cnn_kernel(batch, c0, h0, w0, blocks_cfg, len(fc_list),
                             h_f, fc_chunk)
    out_classes = fc_list[-1]

    def pack_params(params):
        flat = []
        for i, blk in enumerate(params["conv_blocks"]):
            wdim = pack_cfg[i]["w"]
            flat += [
                jnp.asarray(_toeplitz(np.asarray(blk["w1"]), wdim,
                                      pack_cfg[i]["stride"],
                                      pack_cfg[i]["chan_major"])),
                jnp.asarray(np.tile(np.asarray(blk["b1"]), wdim)[None, :]),
                jnp.asarray(_toeplitz(np.asarray(blk["w2"]), wdim, 1, False)),
                jnp.asarray(np.tile(np.asarray(blk["b2"]), wdim)[None, :]),
                jnp.asarray(np.tile(np.asarray(blk["gamma"]), wdim)[None, :]),
                jnp.asarray(np.tile(np.asarray(blk["beta"]), wdim)[None, :]),
            ]
        for l, layer in enumerate(params["fc"]):
            if l == 0:
                w = jnp.asarray(_pack_fc1(np.asarray(layer["w"]),
                                          c_f, h_f, w_f, stride_f))
            else:
                w = layer["w"]
            flat += [w, layer["b"].reshape(1, -1)]
        return tuple(flat)

    @jax.jit
    def forward(x_nchw, flat_params):
        return pl.pallas_call(
            kernel,
            out_shape=jax.ShapeDtypeStruct((batch, out_classes), jnp.float32),
            scratch_shapes=scratch_shapes,
            compiler_params=pltpu.CompilerParams(
                vmem_limit_bytes=32 * 1024 * 1024),
        )(x_nchw.astype(jnp.float32), *flat_params)

    return forward, pack_params


# ---------------------------------------------------------------------------
# Parameter init (PyTorch-layout weights) + pure-JAX reference
# ---------------------------------------------------------------------------

def init_params(key, input_shape, filter_list, fc_list, maxpool_list):
    c0, d1, d2 = input_shape
    params = {"conv_blocks": [], "fc": []}
    for i, cout in enumerate(filter_list):
        cin = c0 if i == 0 else filter_list[i - 1]
        key, k1, k2, k3, k4 = jax.random.split(key, 5)
        params["conv_blocks"].append({
            "w1": 0.1 * jax.random.normal(k1, (3, 3, cin, cout), jnp.float32),
            "b1": 0.01 * jax.random.normal(k2, (cout,), jnp.float32),
            "w2": 0.1 * jax.random.normal(k3, (3, 3, cout, cout), jnp.float32),
            "b2": 0.01 * jax.random.normal(k4, (cout,), jnp.float32),
            "gamma": jnp.ones((cout,), jnp.float32),
            "beta": jnp.zeros((cout,), jnp.float32),
        })
    n_pool = sum(maxpool_list)
    h_f, w_f = d1 // 2 ** n_pool, d2 // 2 ** n_pool
    flat = filter_list[-1] * h_f * w_f
    for i, fout in enumerate(fc_list):
        fin = flat if i == 0 else fc_list[i - 1]
        key, k1, k2 = jax.random.split(key, 3)
        params["fc"].append({
            # rows of the first FC weight are in PyTorch NCHW-flatten order
            "w": 0.1 * jax.random.normal(k1, (fin, fout), jnp.float32),
            "b": 0.01 * jax.random.normal(k2, (fout,), jnp.float32),
        })
    return params


def reference_forward(x_nchw, params, maxpool_list):
    """Pure-JAX/XLA reference of the PyTorch module (train-mode BN, dropout=0)."""
    hp = jax.lax.Precision.HIGHEST
    x = x_nchw.astype(jnp.float32)
    for bi, blk in enumerate(params["conv_blocks"]):
        for w_, b_ in ((blk["w1"], blk["b1"]), (blk["w2"], blk["b2"])):
            x = jax.lax.conv_general_dilated(
                x, w_, (1, 1), "SAME",
                dimension_numbers=("NCHW", "HWIO", "NCHW"),
                precision=hp) + b_[None, :, None, None]
        x = jnp.maximum(x, 0.0)
        mean = jnp.mean(x, axis=(0, 2, 3), keepdims=True)
        var = jnp.mean(jnp.square(x - mean), axis=(0, 2, 3), keepdims=True)
        x = (x - mean) * jax.lax.rsqrt(var + 1e-5)
        x = (x * blk["gamma"][None, :, None, None]
             + blk["beta"][None, :, None, None])
        if maxpool_list[bi]:
            x = jax.lax.reduce_window(x, -jnp.inf, jax.lax.max,
                                      (1, 1, 2, 2), (1, 1, 2, 2), "VALID")
    xf = x.reshape(x.shape[0], -1)                 # PyTorch NCHW flatten
    n_fc = len(params["fc"])
    for i, layer in enumerate(params["fc"]):
        xf = jnp.dot(xf, layer["w"], precision=hp) + layer["b"]
        if i < n_fc - 1:
            xf = jnp.maximum(xf, 0.0)
    return jax.nn.log_softmax(xf, axis=1)


if __name__ == "__main__":
    # Config chosen so the module's own `start_neurons` formula is consistent:
    #   start_neurons = prod((4,16,16)) * 8 / (2**1)**4 = 512 == actual flatten.
    input_shape = (4, 16, 16)          # (C, D1, D2)
    filter_list = [8, 8]
    maxpool_list = [1, 0]
    fc_list = [32, 10]
    batch = 2

    key = jax.random.PRNGKey(0)
    key, kx = jax.random.split(key)
    x = jax.random.normal(kx, (batch,) + input_shape, jnp.float32)  # NCHW input

    params = init_params(key, input_shape, filter_list, fc_list, maxpool_list)
    forward, pack_params = build_cnn_forward(input_shape, filter_list,
                                             maxpool_list, fc_list, batch)
    flat_params = pack_params(params)

    out = jax.block_until_ready(forward(x, flat_params))
    assert out.shape == (batch, fc_list[-1])

    ref = reference_forward(x, params, maxpool_list)
    err = float(jnp.max(jnp.abs(out - ref)))
    assert err < 2e-3, f"mismatch vs reference: max abs err = {err}"

    print("KERNEL_OK")
</pallas_src>

<mosaic_0001>
module attributes {stable_mosaic.version = 11 : i64} {
  func.func @kernel(%arg0: memref<2x4x16x16xf32, #tpu.memory_space<vmem>>, %arg1: memref<3x64x128xf32, #tpu.memory_space<vmem>>, %arg2: memref<1x128xf32, #tpu.memory_space<vmem>>, %arg3: memref<3x128x128xf32, #tpu.memory_space<vmem>>, %arg4: memref<1x128xf32, #tpu.memory_space<vmem>>, %arg5: memref<1x128xf32, #tpu.memory_space<vmem>>, %arg6: memref<1x128xf32, #tpu.memory_space<vmem>>, %arg7: memref<3x128x64xf32, #tpu.memory_space<vmem>>, %arg8: memref<1x64xf32, #tpu.memory_space<vmem>>, %arg9: memref<3x64x64xf32, #tpu.memory_space<vmem>>, %arg10: memref<1x64xf32, #tpu.memory_space<vmem>>, %arg11: memref<1x64xf32, #tpu.memory_space<vmem>>, %arg12: memref<1x64xf32, #tpu.memory_space<vmem>>, %arg13: memref<512x32xf32, #tpu.memory_space<vmem>>, %arg14: memref<1x32xf32, #tpu.memory_space<vmem>>, %arg15: memref<32x10xf32, #tpu.memory_space<vmem>>, %arg16: memref<1x10xf32, #tpu.memory_space<vmem>>, %arg17: memref<2x10xf32, #tpu.memory_space<vmem>>, %arg18: memref<32x128xf32, #tpu.memory_space<vmem>>, %arg19: memref<16x64xf32, #tpu.memory_space<vmem>>) attributes {dimension_semantics = [], scalar_prefetch = 0 : i64, scratch_operands = 2 : i64, tpu.core_type = #tpu.core_type<tc>} {
    %c0 = arith.constant 0 : index
    %c0_0 = arith.constant 0 : index
    %c0_1 = arith.constant 0 : index
    %c0_2 = arith.constant 0 : index
    %0 = vector.load %arg0[%c0, %c0_0, %c0_1, %c0_2] : memref<2x4x16x16xf32, #tpu.memory_space<vmem>>, vector<2x4x16x16xf32>
    %1 = vector.extract_strided_slice %0 {offsets = [0, 0, 0, 0], sizes = [2, 1, 16, 16], strides = [1, 1, 1, 1]} : vector<2x4x16x16xf32> to vector<2x1x16x16xf32>
    %2 = vector.shape_cast %1 : vector<2x1x16x16xf32> to vector<2x16x16xf32>
    %3 = vector.shape_cast %2 : vector<2x16x16xf32> to vector<32x16xf32>
    %4 = vector.extract_strided_slice %0 {offsets = [0, 1, 0, 0], sizes = [2, 1, 16, 16], strides = [1, 1, 1, 1]} : vector<2x4x16x16xf32> to vector<2x1x16x16xf32>
    %5 = vector.shape_cast %4 : vector<2x1x16x16xf32> to vector<2x16x16xf32>
    %6 = vector.shape_cast %5 : vector<2x16x16xf32> to vector<32x16xf32>
    %7 = vector.extract_strided_slice %0 {offsets = [0, 2, 0, 0], sizes = [2, 1, 16, 16], strides = [1, 1, 1, 1]} : vector<2x4x16x16xf32> to vector<2x1x16x16xf32>
    %8 = vector.shape_cast %7 : vector<2x1x16x16xf32> to vector<2x16x16xf32>
    %9 = vector.shape_cast %8 : vector<2x16x16xf32> to vector<32x16xf32>
    %10 = vector.extract_strided_slice %0 {offsets = [0, 3, 0, 0], sizes = [2, 1, 16, 16], strides = [1, 1, 1, 1]} : vector<2x4x16x16xf32> to vector<2x1x16x16xf32>
    %11 = vector.shape_cast %10 : vector<2x1x16x16xf32> to vector<2x16x16xf32>
    %12 = vector.shape_cast %11 : vector<2x16x16xf32> to vector<32x16xf32>
    %13 = tpu.concatenate %3, %6, %9, %12 in 1 : vector<32x16xf32>, vector<32x16xf32>, vector<32x16xf32>, vector<32x16xf32> -> vector<32x64xf32>
    %14 = tpu.iota {dimensions = array<i32: 0>} : vector<32x64xi32>
    %c15_i32 = arith.constant 15 : i32
    %15 = vector.broadcast %c15_i32 : i32 to vector<32x64xi32>
    %16 = arith.andi %14, %15 : vector<32x64xi32>
    %cst = arith.constant 0.000000e+00 : f32
    %17 = vector.broadcast %cst : f32 to vector<1x64xf32>
    %c0_i32 = arith.constant 0 : i32
    %18 = vector.broadcast %c0_i32 : i32 to vector<32x64xi32>
    %19 = arith.cmpi eq, %16, %18 : vector<32x64xi32>
    %20 = vector.extract_strided_slice %13 {offsets = [0, 0], sizes = [31, 64], strides = [1, 1]} : vector<32x64xf32> to vector<31x64xf32>
    %21 = tpu.concatenate %17, %20 in 0 : vector<1x64xf32>, vector<31x64xf32> -> vector<32x64xf32>
    %cst_3 = arith.constant 0.000000e+00 : f32
    %22 = vector.broadcast %cst_3 : f32 to vector<32x64xf32>
    %23 = arith.select %19, %22, %21 : vector<32x64xi1>, vector<32x64xf32>
    %c15_i32_4 = arith.constant 15 : i32
    %24 = vector.broadcast %c15_i32_4 : i32 to vector<32x64xi32>
    %25 = arith.cmpi eq, %16, %24 : vector<32x64xi32>
    %26 = vector.extract_strided_slice %13 {offsets = [1, 0], sizes = [31, 64], strides = [1, 1]} : vector<32x64xf32> to vector<31x64xf32>
    %27 = tpu.concatenate %26, %17 in 0 : vector<31x64xf32>, vector<1x64xf32> -> vector<32x64xf32>
    %cst_5 = arith.constant 0.000000e+00 : f32
    %28 = vector.broadcast %cst_5 : f32 to vector<32x64xf32>
    %29 = arith.select %25, %28, %27 : vector<32x64xi1>, vector<32x64xf32>
    %c0_6 = arith.constant 0 : index
    %c0_7 = arith.constant 0 : index
    %c0_8 = arith.constant 0 : index
    %30 = vector.load %arg1[%c0_6, %c0_7, %c0_8] : memref<3x64x128xf32, #tpu.memory_space<vmem>>, vector<1x64x128xf32>
    %31 = vector.shape_cast %30 : vector<1x64x128xf32> to vector<64x128xf32>
    %cst_9 = arith.constant dense<0.000000e+00> : vector<32x128xf32>
    %32 = tpu.matmul %23, %31, %cst_9 {dimension_numbers = #tpu.dot_dimension_numbers<[1], [0], [0], [1], [0, 0, 1, 1], [], []>} : vector<32x64xf32>, vector<64x128xf32>, vector<32x128xf32> -> vector<32x128xf32>
    %c1 = arith.constant 1 : index
    %c0_10 = arith.constant 0 : index
    %c0_11 = arith.constant 0 : index
    %33 = vector.load %arg1[%c1, %c0_10, %c0_11] : memref<3x64x128xf32, #tpu.memory_space<vmem>>, vector<1x64x128xf32>
    %34 = vector.shape_cast %33 : vector<1x64x128xf32> to vector<64x128xf32>
    %cst_12 = arith.constant dense<0.000000e+00> : vector<32x128xf32>
    %35 = tpu.matmul %13, %34, %cst_12 {dimension_numbers = #tpu.dot_dimension_numbers<[1], [0], [0], [1], [0, 0, 1, 1], [], []>} : vector<32x64xf32>, vector<64x128xf32>, vector<32x128xf32> -> vector<32x128xf32>
    %36 = arith.addf %32, %35 : vector<32x128xf32>
    %c2 = arith.constant 2 : index
    %c0_13 = arith.constant 0 : index
    %c0_14 = arith.constant 0 : index
    %37 = vector.load %arg1[%c2, %c0_13, %c0_14] : memref<3x64x128xf32, #tpu.memory_space<vmem>>, vector<1x64x128xf32>
    %38 = vector.shape_cast %37 : vector<1x64x128xf32> to vector<64x128xf32>
    %cst_15 = arith.constant dense<0.000000e+00> : vector<32x128xf32>
    %39 = tpu.matmul %29, %38, %cst_15 {dimension_numbers = #tpu.dot_dimension_numbers<[1], [0], [0], [1], [0, 0, 1, 1], [], []>} : vector<32x64xf32>, vector<64x128xf32>, vector<32x128xf32> -> vector<32x128xf32>
    %40 = arith.addf %36, %39 : vector<32x128xf32>
    %c0_16 = arith.constant 0 : index
    %c0_17 = arith.constant 0 : index
    %41 = vector.load %arg2[%c0_16, %c0_17] : memref<1x128xf32, #tpu.memory_space<vmem>>, vector<1x128xf32>
    %42 = vector.broadcast %41 : vector<1x128xf32> to vector<32x128xf32>
    %43 = arith.addf %40, %42 : vector<32x128xf32>
    %44 = tpu.iota {dimensions = array<i32: 0>} : vector<32x128xi32>
    %c15_i32_18 = arith.constant 15 : i32
    %45 = vector.broadcast %c15_i32_18 : i32 to vector<32x128xi32>
    %46 = arith.andi %44, %45 : vector<32x128xi32>
    %cst_19 = arith.constant 0.000000e+00 : f32
    %47 = vector.broadcast %cst_19 : f32 to vector<1x128xf32>
    %c0_i32_20 = arith.constant 0 : i32
    %48 = vector.broadcast %c0_i32_20 : i32 to vector<32x128xi32>
    %49 = arith.cmpi eq, %46, %48 : vector<32x128xi32>
    %50 = vector.extract_strided_slice %43 {offsets = [0, 0], sizes = [31, 128], strides = [1, 1]} : vector<32x128xf32> to vector<31x128xf32>
    %51 = tpu.concatenate %47, %50 in 0 : vector<1x128xf32>, vector<31x128xf32> -> vector<32x128xf32>
    %cst_21 = arith.constant 0.000000e+00 : f32
    %52 = vector.broadcast %cst_21 : f32 to vector<32x128xf32>
    %53 = arith.select %49, %52, %51 : vector<32x128xi1>, vector<32x128xf32>
    %c15_i32_22 = arith.constant 15 : i32
    %54 = vector.broadcast %c15_i32_22 : i32 to vector<32x128xi32>
    %55 = arith.cmpi eq, %46, %54 : vector<32x128xi32>
    %56 = vector.extract_strided_slice %43 {offsets = [1, 0], sizes = [31, 128], strides = [1, 1]} : vector<32x128xf32> to vector<31x128xf32>
    %57 = tpu.concatenate %56, %47 in 0 : vector<31x128xf32>, vector<1x128xf32> -> vector<32x128xf32>
    %cst_23 = arith.constant 0.000000e+00 : f32
    %58 = vector.broadcast %cst_23 : f32 to vector<32x128xf32>
    %59 = arith.select %55, %58, %57 : vector<32x128xi1>, vector<32x128xf32>
    %c0_24 = arith.constant 0 : index
    %c0_25 = arith.constant 0 : index
    %c0_26 = arith.constant 0 : index
    %60 = vector.load %arg3[%c0_24, %c0_25, %c0_26] : memref<3x128x128xf32, #tpu.memory_space<vmem>>, vector<1x128x128xf32>
    %61 = vector.shape_cast %60 : vector<1x128x128xf32> to vector<128x128xf32>
    %cst_27 = arith.constant dense<0.000000e+00> : vector<32x128xf32>
    %62 = tpu.matmul %53, %61, %cst_27 {dimension_numbers = #tpu.dot_dimension_numbers<[1], [0], [0], [1], [0, 0, 1, 1], [], []>} : vector<32x128xf32>, vector<128x128xf32>, vector<32x128xf32> -> vector<32x128xf32>
    %c1_28 = arith.constant 1 : index
    %c0_29 = arith.constant 0 : index
    %c0_30 = arith.constant 0 : index
    %63 = vector.load %arg3[%c1_28, %c0_29, %c0_30] : memref<3x128x128xf32, #tpu.memory_space<vmem>>, vector<1x128x128xf32>
    %64 = vector.shape_cast %63 : vector<1x128x128xf32> to vector<128x128xf32>
    %cst_31 = arith.constant dense<0.000000e+00> : vector<32x128xf32>
    %65 = tpu.matmul %43, %64, %cst_31 {dimension_numbers = #tpu.dot_dimension_numbers<[1], [0], [0], [1], [0, 0, 1, 1], [], []>} : vector<32x128xf32>, vector<128x128xf32>, vector<32x128xf32> -> vector<32x128xf32>
    %66 = arith.addf %62, %65 : vector<32x128xf32>
    %c2_32 = arith.constant 2 : index
    %c0_33 = arith.constant 0 : index
    %c0_34 = arith.constant 0 : index
    %67 = vector.load %arg3[%c2_32, %c0_33, %c0_34] : memref<3x128x128xf32, #tpu.memory_space<vmem>>, vector<1x128x128xf32>
    %68 = vector.shape_cast %67 : vector<1x128x128xf32> to vector<128x128xf32>
    %cst_35 = arith.constant dense<0.000000e+00> : vector<32x128xf32>
    %69 = tpu.matmul %59, %68, %cst_35 {dimension_numbers = #tpu.dot_dimension_numbers<[1], [0], [0], [1], [0, 0, 1, 1], [], []>} : vector<32x128xf32>, vector<128x128xf32>, vector<32x128xf32> -> vector<32x128xf32>
    %70 = arith.addf %66, %69 : vector<32x128xf32>
    %c0_36 = arith.constant 0 : index
    %c0_37 = arith.constant 0 : index
    %71 = vector.load %arg4[%c0_36, %c0_37] : memref<1x128xf32, #tpu.memory_space<vmem>>, vector<1x128xf32>
    %72 = vector.broadcast %71 : vector<1x128xf32> to vector<32x128xf32>
    %73 = arith.addf %70, %72 : vector<32x128xf32>
    %c0_38 = arith.constant 0 : index
    %c0_39 = arith.constant 0 : index
    %74 = vector.load %arg5[%c0_38, %c0_39] : memref<1x128xf32, #tpu.memory_space<vmem>>, vector<1x128xf32>
    %c0_40 = arith.constant 0 : index
    %c0_41 = arith.constant 0 : index
    %75 = vector.load %arg6[%c0_40, %c0_41] : memref<1x128xf32, #tpu.memory_space<vmem>>, vector<1x128xf32>
    %cst_42 = arith.constant 0.000000e+00 : f32
    %76 = vector.broadcast %cst_42 : f32 to vector<32x128xf32>
    %77 = arith.maximumf %73, %76 : vector<32x128xf32>
    %cst_43 = arith.constant dense<0.000000e+00> : vector<128xf32>
    %78 = vector.multi_reduction <add>, %77, %cst_43 [0] : vector<32x128xf32> to vector<128xf32>
    %79 = vector.shape_cast %78 : vector<128xf32> to vector<1x128xf32>
    %c8_i32 = arith.constant 8 : i32
    %80 = tpu.dynamic_rotate %79 by %c8_i32 dim 1 : vector<1x128xf32>, i32 -> vector<1x128xf32>
    %81 = arith.addf %79, %80 : vector<1x128xf32>
    %c16_i32 = arith.constant 16 : i32
    %82 = tpu.dynamic_rotate %81 by %c16_i32 dim 1 : vector<1x128xf32>, i32 -> vector<1x128xf32>
    %83 = arith.addf %81, %82 : vector<1x128xf32>
    %c32_i32 = arith.constant 32 : i32
    %84 = tpu.dynamic_rotate %83 by %c32_i32 dim 1 : vector<1x128xf32>, i32 -> vector<1x128xf32>
    %85 = arith.addf %83, %84 : vector<1x128xf32>
    %c64_i32 = arith.constant 64 : i32
    %86 = tpu.dynamic_rotate %85 by %c64_i32 dim 1 : vector<1x128xf32>, i32 -> vector<1x128xf32>
    %87 = arith.addf %85, %86 : vector<1x128xf32>
    %88 = arith.mulf %77, %77 : vector<32x128xf32>
    %cst_44 = arith.constant dense<0.000000e+00> : vector<128xf32>
    %89 = vector.multi_reduction <add>, %88, %cst_44 [0] : vector<32x128xf32> to vector<128xf32>
    %90 = vector.shape_cast %89 : vector<128xf32> to vector<1x128xf32>
    %c8_i32_45 = arith.constant 8 : i32
    %91 = tpu.dynamic_rotate %90 by %c8_i32_45 dim 1 : vector<1x128xf32>, i32 -> vector<1x128xf32>
    %92 = arith.addf %90, %91 : vector<1x128xf32>
    %c16_i32_46 = arith.constant 16 : i32
    %93 = tpu.dynamic_rotate %92 by %c16_i32_46 dim 1 : vector<1x128xf32>, i32 -> vector<1x128xf32>
    %94 = arith.addf %92, %93 : vector<1x128xf32>
    %c32_i32_47 = arith.constant 32 : i32
    %95 = tpu.dynamic_rotate %94 by %c32_i32_47 dim 1 : vector<1x128xf32>, i32 -> vector<1x128xf32>
    %96 = arith.addf %94, %95 : vector<1x128xf32>
    %c64_i32_48 = arith.constant 64 : i32
    %97 = tpu.dynamic_rotate %96 by %c64_i32_48 dim 1 : vector<1x128xf32>, i32 -> vector<1x128xf32>
    %98 = arith.addf %96, %97 : vector<1x128xf32>
    %cst_49 = arith.constant 0.001953125 : f32
    %99 = vector.broadcast %cst_49 : f32 to vector<1x128xf32>
    %100 = arith.mulf %87, %99 : vector<1x128xf32>
    %cst_50 = arith.constant 0.001953125 : f32
    %101 = vector.broadcast %cst_50 : f32 to vector<1x128xf32>
    %102 = arith.mulf %98, %101 : vector<1x128xf32>
    %103 = arith.mulf %100, %100 : vector<1x128xf32>
    %104 = arith.subf %102, %103 : vector<1x128xf32>
    %cst_51 = arith.constant 0.000000e+00 : f32
    %105 = vector.broadcast %cst_51 : f32 to vector<1x128xf32>
    %106 = arith.maximumf %104, %105 : vector<1x128xf32>
    %cst_52 = arith.constant 9.99999974E-6 : f32
    %107 = vector.broadcast %cst_52 : f32 to vector<1x128xf32>
    %108 = arith.addf %106, %107 : vector<1x128xf32>
    %109 = math.rsqrt %108 : vector<1x128xf32>
    %110 = arith.mulf %109, %74 : vector<1x128xf32>
    %111 = arith.mulf %100, %110 : vector<1x128xf32>
    %112 = arith.subf %75, %111 : vector<1x128xf32>
    %113 = vector.broadcast %110 : vector<1x128xf32> to vector<32x128xf32>
    %114 = arith.mulf %77, %113 : vector<32x128xf32>
    %115 = vector.broadcast %112 : vector<1x128xf32> to vector<32x128xf32>
    %116 = arith.addf %114, %115 : vector<32x128xf32>
    %c0_53 = arith.constant 0 : index
    %c0_54 = arith.constant 0 : index
    %117 = vector.load %arg18[%c0_53, %c0_54] : memref<32x128xf32, #tpu.memory_space<vmem>>, vector<32x128xf32>
    tpu.vector_store %arg18[%c0_53, %c0_54], %116 {strides = array<i32>} : memref<32x128xf32, #tpu.memory_space<vmem>>, vector<32x128xf32>,
    %c0_55 = arith.constant 0 : index
    %c0_56 = arith.constant 0 : index
    %118 = tpu.strided_load %arg18[%c0_55, %c0_56] {strides = array<i32: 2, 1>} : memref<32x128xf32, #tpu.memory_space<vmem>>, vector<16x128xf32>
    %c1_57 = arith.constant 1 : index
    %c0_58 = arith.constant 0 : index
    %119 = tpu.strided_load %arg18[%c1_57, %c0_58] {strides = array<i32: 2, 1>} : memref<32x128xf32, #tpu.memory_space<vmem>>, vector<16x128xf32>
    %120 = arith.maximumf %118, %119 : vector<16x128xf32>
    %c120_i32 = arith.constant 120 : i32
    %121 = tpu.dynamic_rotate %120 by %c120_i32 dim 1 : vector<16x128xf32>, i32 -> vector<16x128xf32>
    %122 = arith.maximumf %120, %121 : vector<16x128xf32>
    %123 = tpu.iota {dimensions = array<i32: 0>} : vector<16x128xi32>
    %c7_i32 = arith.constant 7 : i32
    %124 = vector.broadcast %c7_i32 : i32 to vector<16x128xi32>
    %125 = arith.andi %123, %124 : vector<16x128xi32>
    %cst_59 = arith.constant 0.000000e+00 : f32
    %126 = vector.broadcast %cst_59 : f32 to vector<1x128xf32>
    %c0_i32_60 = arith.constant 0 : i32
    %127 = vector.broadcast %c0_i32_60 : i32 to vector<16x128xi32>
    %128 = arith.cmpi eq, %125, %127 : vector<16x128xi32>
    %129 = vector.extract_strided_slice %122 {offsets = [0, 0], sizes = [15, 128], strides = [1, 1]} : vector<16x128xf32> to vector<15x128xf32>
    %130 = tpu.concatenate %126, %129 in 0 : vector<1x128xf32>, vector<15x128xf32> -> vector<16x128xf32>
    %cst_61 = arith.constant 0.000000e+00 : f32
    %131 = vector.broadcast %cst_61 : f32 to vector<16x128xf32>
    %132 = arith.select %128, %131, %130 : vector<16x128xi1>, vector<16x128xf32>
    %c7_i32_62 = arith.constant 7 : i32
    %133 = vector.broadcast %c7_i32_62 : i32 to vector<16x128xi32>
    %134 = arith.cmpi eq, %125, %133 : vector<16x128xi32>
    %135 = vector.extract_strided_slice %122 {offsets = [1, 0], sizes = [15, 128], strides = [1, 1]} : vector<16x128xf32> to vector<15x128xf32>
    %136 = tpu.concatenate %135, %126 in 0 : vector<15x128xf32>, vector<1x128xf32> -> vector<16x128xf32>
    %cst_63 = arith.constant 0.000000e+00 : f32
    %137 = vector.broadcast %cst_63 : f32 to vector<16x128xf32>
    %138 = arith.select %134, %137, %136 : vector<16x128xi1>, vector<16x128xf32>
    %c0_64 = arith.constant 0 : index
    %c0_65 = arith.constant 0 : index
    %c0_66 = arith.constant 0 : index
    %139 = vector.load %arg7[%c0_64, %c0_65, %c0_66] : memref<3x128x64xf32, #tpu.memory_space<vmem>>, vector<1x128x64xf32>
    %140 = vector.shape_cast %139 : vector<1x128x64xf32> to vector<128x64xf32>
    %cst_67 = arith.constant dense<0.000000e+00> : vector<16x64xf32>
    %141 = tpu.matmul %132, %140, %cst_67 {dimension_numbers = #tpu.dot_dimension_numbers<[1], [0], [0], [1], [0, 0, 1, 1], [], []>} : vector<16x128xf32>, vector<128x64xf32>, vector<16x64xf32> -> vector<16x64xf32>
    %c1_68 = arith.constant 1 : index
    %c0_69 = arith.constant 0 : index
    %c0_70 = arith.constant 0 : index
    %142 = vector.load %arg7[%c1_68, %c0_69, %c0_70] : memref<3x128x64xf32, #tpu.memory_space<vmem>>, vector<1x128x64xf32>
    %143 = vector.shape_cast %142 : vector<1x128x64xf32> to vector<128x64xf32>
    %cst_71 = arith.constant dense<0.000000e+00> : vector<16x64xf32>
    %144 = tpu.matmul %122, %143, %cst_71 {dimension_numbers = #tpu.dot_dimension_numbers<[1], [0], [0], [1], [0, 0, 1, 1], [], []>} : vector<16x128xf32>, vector<128x64xf32>, vector<16x64xf32> -> vector<16x64xf32>
    %145 = arith.addf %141, %144 : vector<16x64xf32>
    %c2_72 = arith.constant 2 : index
    %c0_73 = arith.constant 0 : index
    %c0_74 = arith.constant 0 : index
    %146 = vector.load %arg7[%c2_72, %c0_73, %c0_74] : memref<3x128x64xf32, #tpu.memory_space<vmem>>, vector<1x128x64xf32>
    %147 = vector.shape_cast %146 : vector<1x128x64xf32> to vector<128x64xf32>
    %cst_75 = arith.constant dense<0.000000e+00> : vector<16x64xf32>
    %148 = tpu.matmul %138, %147, %cst_75 {dimension_numbers = #tpu.dot_dimension_numbers<[1], [0], [0], [1], [0, 0, 1, 1], [], []>} : vector<16x128xf32>, vector<128x64xf32>, vector<16x64xf32> -> vector<16x64xf32>
    %149 = arith.addf %145, %148 : vector<16x64xf32>
    %c0_76 = arith.constant 0 : index
    %c0_77 = arith.constant 0 : index
    %150 = vector.load %arg8[%c0_76, %c0_77] : memref<1x64xf32, #tpu.memory_space<vmem>>, vector<1x64xf32>
    %151 = vector.broadcast %150 : vector<1x64xf32> to vector<16x64xf32>
    %152 = arith.addf %149, %151 : vector<16x64xf32>
    %153 = tpu.iota {dimensions = array<i32: 0>} : vector<16x64xi32>
    %c7_i32_78 = arith.constant 7 : i32
    %154 = vector.broadcast %c7_i32_78 : i32 to vector<16x64xi32>
    %155 = arith.andi %153, %154 : vector<16x64xi32>
    %cst_79 = arith.constant 0.000000e+00 : f32
    %156 = vector.broadcast %cst_79 : f32 to vector<1x64xf32>
    %c0_i32_80 = arith.constant 0 : i32
    %157 = vector.broadcast %c0_i32_80 : i32 to vector<16x64xi32>
    %158 = arith.cmpi eq, %155, %157 : vector<16x64xi32>
    %159 = vector.extract_strided_slice %152 {offsets = [0, 0], sizes = [15, 64], strides = [1, 1]} : vector<16x64xf32> to vector<15x64xf32>
    %160 = tpu.concatenate %156, %159 in 0 : vector<1x64xf32>, vector<15x64xf32> -> vector<16x64xf32>
    %cst_81 = arith.constant 0.000000e+00 : f32
    %161 = vector.broadcast %cst_81 : f32 to vector<16x64xf32>
    %162 = arith.select %158, %161, %160 : vector<16x64xi1>, vector<16x64xf32>
    %c7_i32_82 = arith.constant 7 : i32
    %163 = vector.broadcast %c7_i32_82 : i32 to vector<16x64xi32>
    %164 = arith.cmpi eq, %155, %163 : vector<16x64xi32>
    %165 = vector.extract_strided_slice %152 {offsets = [1, 0], sizes = [15, 64], strides = [1, 1]} : vector<16x64xf32> to vector<15x64xf32>
    %166 = tpu.concatenate %165, %156 in 0 : vector<15x64xf32>, vector<1x64xf32> -> vector<16x64xf32>
    %cst_83 = arith.constant 0.000000e+00 : f32
    %167 = vector.broadcast %cst_83 : f32 to vector<16x64xf32>
    %168 = arith.select %164, %167, %166 : vector<16x64xi1>, vector<16x64xf32>
    %c0_84 = arith.constant 0 : index
    %c0_85 = arith.constant 0 : index
    %c0_86 = arith.constant 0 : index
    %169 = vector.load %arg9[%c0_84, %c0_85, %c0_86] : memref<3x64x64xf32, #tpu.memory_space<vmem>>, vector<1x64x64xf32>
    %170 = vector.shape_cast %169 : vector<1x64x64xf32> to vector<64x64xf32>
    %cst_87 = arith.constant dense<0.000000e+00> : vector<16x64xf32>
    %171 = tpu.matmul %162, %170, %cst_87 {dimension_numbers = #tpu.dot_dimension_numbers<[1], [0], [0], [1], [0, 0, 1, 1], [], []>} : vector<16x64xf32>, vector<64x64xf32>, vector<16x64xf32> -> vector<16x64xf32>
    %c1_88 = arith.constant 1 : index
    %c0_89 = arith.constant 0 : index
    %c0_90 = arith.constant 0 : index
    %172 = vector.load %arg9[%c1_88, %c0_89, %c0_90] : memref<3x64x64xf32, #tpu.memory_space<vmem>>, vector<1x64x64xf32>
    %173 = vector.shape_cast %172 : vector<1x64x64xf32> to vector<64x64xf32>
    %cst_91 = arith.constant dense<0.000000e+00> : vector<16x64xf32>
    %174 = tpu.matmul %152, %173, %cst_91 {dimension_numbers = #tpu.dot_dimension_numbers<[1], [0], [0], [1], [0, 0, 1, 1], [], []>} : vector<16x64xf32>, vector<64x64xf32>, vector<16x64xf32> -> vector<16x64xf32>
    %175 = arith.addf %171, %174 : vector<16x64xf32>
    %c2_92 = arith.constant 2 : index
    %c0_93 = arith.constant 0 : index
    %c0_94 = arith.constant 0 : index
    %176 = vector.load %arg9[%c2_92, %c0_93, %c0_94] : memref<3x64x64xf32, #tpu.memory_space<vmem>>, vector<1x64x64xf32>
    %177 = vector.shape_cast %176 : vector<1x64x64xf32> to vector<64x64xf32>
    %cst_95 = arith.constant dense<0.000000e+00> : vector<16x64xf32>
    %178 = tpu.matmul %168, %177, %cst_95 {dimension_numbers = #tpu.dot_dimension_numbers<[1], [0], [0], [1], [0, 0, 1, 1], [], []>} : vector<16x64xf32>, vector<64x64xf32>, vector<16x64xf32> -> vector<16x64xf32>
    %179 = arith.addf %175, %178 : vector<16x64xf32>
    %c0_96 = arith.constant 0 : index
    %c0_97 = arith.constant 0 : index
    %180 = vector.load %arg10[%c0_96, %c0_97] : memref<1x64xf32, #tpu.memory_space<vmem>>, vector<1x64xf32>
    %181 = vector.broadcast %180 : vector<1x64xf32> to vector<16x64xf32>
    %182 = arith.addf %179, %181 : vector<16x64xf32>
    %c0_98 = arith.constant 0 : index
    %c0_99 = arith.constant 0 : index
    %183 = vector.load %arg11[%c0_98, %c0_99] : memref<1x64xf32, #tpu.memory_space<vmem>>, vector<1x64xf32>
    %c0_100 = arith.constant 0 : index
    %c0_101 = arith.constant 0 : index
    %184 = vector.load %arg12[%c0_100, %c0_101] : memref<1x64xf32, #tpu.memory_space<vmem>>, vector<1x64xf32>
    %cst_102 = arith.constant 0.000000e+00 : f32
    %185 = vector.broadcast %cst_102 : f32 to vector<16x64xf32>
    %186 = arith.maximumf %182, %185 : vector<16x64xf32>
    %cst_103 = arith.constant dense<0.000000e+00> : vector<64xf32>
    %187 = vector.multi_reduction <add>, %186, %cst_103 [0] : vector<16x64xf32> to vector<64xf32>
    %188 = vector.shape_cast %187 : vector<64xf32> to vector<1x64xf32>
    %c8_i32_104 = arith.constant 8 : i32
    %189 = tpu.dynamic_rotate %188 by %c8_i32_104 dim 1 : vector<1x64xf32>, i32 -> vector<1x64xf32>
    %190 = arith.addf %188, %189 : vector<1x64xf32>
    %c16_i32_105 = arith.constant 16 : i32
    %191 = tpu.dynamic_rotate %190 by %c16_i32_105 dim 1 : vector<1x64xf32>, i32 -> vector<1x64xf32>
    %192 = arith.addf %190, %191 : vector<1x64xf32>
    %c32_i32_106 = arith.constant 32 : i32
    %193 = tpu.dynamic_rotate %192 by %c32_i32_106 dim 1 : vector<1x64xf32>, i32 -> vector<1x64xf32>
    %194 = arith.addf %192, %193 : vector<1x64xf32>
    %195 = arith.mulf %186, %186 : vector<16x64xf32>
    %cst_107 = arith.constant dense<0.000000e+00> : vector<64xf32>
    %196 = vector.multi_reduction <add>, %195, %cst_107 [0] : vector<16x64xf32> to vector<64xf32>
    %197 = vector.shape_cast %196 : vector<64xf32> to vector<1x64xf32>
    %c8_i32_108 = arith.constant 8 : i32
    %198 = tpu.dynamic_rotate %197 by %c8_i32_108 dim 1 : vector<1x64xf32>, i32 -> vector<1x64xf32>
    %199 = arith.addf %197, %198 : vector<1x64xf32>
    %c16_i32_109 = arith.constant 16 : i32
    %200 = tpu.dynamic_rotate %199 by %c16_i32_109 dim 1 : vector<1x64xf32>, i32 -> vector<1x64xf32>
    %201 = arith.addf %199, %200 : vector<1x64xf32>
    %c32_i32_110 = arith.constant 32 : i32
    %202 = tpu.dynamic_rotate %201 by %c32_i32_110 dim 1 : vector<1x64xf32>, i32 -> vector<1x64xf32>
    %203 = arith.addf %201, %202 : vector<1x64xf32>
    %cst_111 = arith.constant 7.812500e-03 : f32
    %204 = vector.broadcast %cst_111 : f32 to vector<1x64xf32>
    %205 = arith.mulf %194, %204 : vector<1x64xf32>
    %cst_112 = arith.constant 7.812500e-03 : f32
    %206 = vector.broadcast %cst_112 : f32 to vector<1x64xf32>
    %207 = arith.mulf %203, %206 : vector<1x64xf32>
    %208 = arith.mulf %205, %205 : vector<1x64xf32>
    %209 = arith.subf %207, %208 : vector<1x64xf32>
    %cst_113 = arith.constant 0.000000e+00 : f32
    %210 = vector.broadcast %cst_113 : f32 to vector<1x64xf32>
    %211 = arith.maximumf %209, %210 : vector<1x64xf32>
    %cst_114 = arith.constant 9.99999974E-6 : f32
    %212 = vector.broadcast %cst_114 : f32 to vector<1x64xf32>
    %213 = arith.addf %211, %212 : vector<1x64xf32>
    %214 = math.rsqrt %213 : vector<1x64xf32>
    %215 = arith.mulf %214, %183 : vector<1x64xf32>
    %216 = arith.mulf %205, %215 : vector<1x64xf32>
    %217 = arith.subf %184, %216 : vector<1x64xf32>
    %218 = vector.broadcast %215 : vector<1x64xf32> to vector<16x64xf32>
    %219 = arith.mulf %186, %218 : vector<16x64xf32>
    %220 = vector.broadcast %217 : vector<1x64xf32> to vector<16x64xf32>
    %221 = arith.addf %219, %220 : vector<16x64xf32>
    %c0_115 = arith.constant 0 : index
    %c0_116 = arith.constant 0 : index
    %222 = vector.load %arg19[%c0_115, %c0_116] : memref<16x64xf32, #tpu.memory_space<vmem>>, vector<16x64xf32>
    tpu.vector_store %arg19[%c0_115, %c0_116], %221 {strides = array<i32>} : memref<16x64xf32, #tpu.memory_space<vmem>>, vector<16x64xf32>,
    %cst_117 = arith.constant 0.000000e+00 : f32
    %223 = vector.broadcast %cst_117 : f32 to vector<2x32xf32>
    %c0_118 = arith.constant 0 : index
    %c0_119 = arith.constant 0 : index
    %224 = tpu.strided_load %arg19[%c0_118, %c0_119] {strides = array<i32: 8, 1>} : memref<16x64xf32, #tpu.memory_space<vmem>>, vector<2x64xf32>
    %c0_120 = arith.constant 0 : index
    %c0_121 = arith.constant 0 : index
    %225 = vector.load %arg13[%c0_120, %c0_121] : memref<512x32xf32, #tpu.memory_space<vmem>>, vector<64x32xf32>
    %cst_122 = arith.constant dense<0.000000e+00> : vector<2x32xf32>
    %226 = tpu.matmul %224, %225, %cst_122 {dimension_numbers = #tpu.dot_dimension_numbers<[1], [0], [0], [1], [0, 0, 1, 1], [], []>} : vector<2x64xf32>, vector<64x32xf32>, vector<2x32xf32> -> vector<2x32xf32>
    %227 = arith.addf %223, %226 : vector<2x32xf32>
    %c1_123 = arith.constant 1 : index
    %c0_124 = arith.constant 0 : index
    %228 = tpu.strided_load %arg19[%c1_123, %c0_124] {strides = array<i32: 8, 1>} : memref<16x64xf32, #tpu.memory_space<vmem>>, vector<2x64xf32>
    %c64 = arith.constant 64 : index
    %c0_125 = arith.constant 0 : index
    %229 = vector.load %arg13[%c64, %c0_125] : memref<512x32xf32, #tpu.memory_space<vmem>>, vector<64x32xf32>
    %cst_126 = arith.constant dense<0.000000e+00> : vector<2x32xf32>
    %230 = tpu.matmul %228, %229, %cst_126 {dimension_numbers = #tpu.dot_dimension_numbers<[1], [0], [0], [1], [0, 0, 1, 1], [], []>} : vector<2x64xf32>, vector<64x32xf32>, vector<2x32xf32> -> vector<2x32xf32>
    %231 = arith.addf %227, %230 : vector<2x32xf32>
    %c2_127 = arith.constant 2 : index
    %c0_128 = arith.constant 0 : index
    %232 = tpu.strided_load %arg19[%c2_127, %c0_128] {strides = array<i32: 8, 1>} : memref<16x64xf32, #tpu.memory_space<vmem>>, vector<2x64xf32>
    %c128 = arith.constant 128 : index
    %c0_129 = arith.constant 0 : index
    %233 = vector.load %arg13[%c128, %c0_129] : memref<512x32xf32, #tpu.memory_space<vmem>>, vector<64x32xf32>
    %cst_130 = arith.constant dense<0.000000e+00> : vector<2x32xf32>
    %234 = tpu.matmul %232, %233, %cst_130 {dimension_numbers = #tpu.dot_dimension_numbers<[1], [0], [0], [1], [0, 0, 1, 1], [], []>} : vector<2x64xf32>, vector<64x32xf32>, vector<2x32xf32> -> vector<2x32xf32>
    %235 = arith.addf %231, %234 : vector<2x32xf32>
    %c3 = arith.constant 3 : index
    %c0_131 = arith.constant 0 : index
    %236 = tpu.strided_load %arg19[%c3, %c0_131] {strides = array<i32: 8, 1>} : memref<16x64xf32, #tpu.memory_space<vmem>>, vector<2x64xf32>
    %c192 = arith.constant 192 : index
    %c0_132 = arith.constant 0 : index
    %237 = vector.load %arg13[%c192, %c0_132] : memref<512x32xf32, #tpu.memory_space<vmem>>, vector<64x32xf32>
    %cst_133 = arith.constant dense<0.000000e+00> : vector<2x32xf32>
    %238 = tpu.matmul %236, %237, %cst_133 {dimension_numbers = #tpu.dot_dimension_numbers<[1], [0], [0], [1], [0, 0, 1, 1], [], []>} : vector<2x64xf32>, vector<64x32xf32>, vector<2x32xf32> -> vector<2x32xf32>
    %239 = arith.addf %235, %238 : vector<2x32xf32>
    %c4 = arith.constant 4 : index
    %c0_134 = arith.constant 0 : index
    %240 = tpu.strided_load %arg19[%c4, %c0_134] {strides = array<i32: 8, 1>} : memref<16x64xf32, #tpu.memory_space<vmem>>, vector<2x64xf32>
    %c256 = arith.constant 256 : index
    %c0_135 = arith.constant 0 : index
    %241 = vector.load %arg13[%c256, %c0_135] : memref<512x32xf32, #tpu.memory_space<vmem>>, vector<64x32xf32>
    %cst_136 = arith.constant dense<0.000000e+00> : vector<2x32xf32>
    %242 = tpu.matmul %240, %241, %cst_136 {dimension_numbers = #tpu.dot_dimension_numbers<[1], [0], [0], [1], [0, 0, 1, 1], [], []>} : vector<2x64xf32>, vector<64x32xf32>, vector<2x32xf32> -> vector<2x32xf32>
    %243 = arith.addf %239, %242 : vector<2x32xf32>
    %c5 = arith.constant 5 : index
    %c0_137 = arith.constant 0 : index
    %244 = tpu.strided_load %arg19[%c5, %c0_137] {strides = array<i32: 8, 1>} : memref<16x64xf32, #tpu.memory_space<vmem>>, vector<2x64xf32>
    %c320 = arith.constant 320 : index
    %c0_138 = arith.constant 0 : index
    %245 = vector.load %arg13[%c320, %c0_138] : memref<512x32xf32, #tpu.memory_space<vmem>>, vector<64x32xf32>
    %cst_139 = arith.constant dense<0.000000e+00> : vector<2x32xf32>
    %246 = tpu.matmul %244, %245, %cst_139 {dimension_numbers = #tpu.dot_dimension_numbers<[1], [0], [0], [1], [0, 0, 1, 1], [], []>} : vector<2x64xf32>, vector<64x32xf32>, vector<2x32xf32> -> vector<2x32xf32>
    %247 = arith.addf %243, %246 : vector<2x32xf32>
    %c6 = arith.constant 6 : index
    %c0_140 = arith.constant 0 : index
    %248 = tpu.strided_load %arg19[%c6, %c0_140] {strides = array<i32: 8, 1>} : memref<16x64xf32, #tpu.memory_space<vmem>>, vector<2x64xf32>
    %c384 = arith.constant 384 : index
    %c0_141 = arith.constant 0 : index
    %249 = vector.load %arg13[%c384, %c0_141] : memref<512x32xf32, #tpu.memory_space<vmem>>, vector<64x32xf32>
    %cst_142 = arith.constant dense<0.000000e+00> : vector<2x32xf32>
    %250 = tpu.matmul %248, %249, %cst_142 {dimension_numbers = #tpu.dot_dimension_numbers<[1], [0], [0], [1], [0, 0, 1, 1], [], []>} : vector<2x64xf32>, vector<64x32xf32>, vector<2x32xf32> -> vector<2x32xf32>
    %251 = arith.addf %247, %250 : vector<2x32xf32>
    %c7 = arith.constant 7 : index
    %c0_143 = arith.constant 0 : index
    %252 = tpu.strided_load %arg19[%c7, %c0_143] {strides = array<i32: 8, 1>} : memref<16x64xf32, #tpu.memory_space<vmem>>, vector<2x64xf32>
    %c448 = arith.constant 448 : index
    %c0_144 = arith.constant 0 : index
    %253 = vector.load %arg13[%c448, %c0_144] : memref<512x32xf32, #tpu.memory_space<vmem>>, vector<64x32xf32>
    %cst_145 = arith.constant dense<0.000000e+00> : vector<2x32xf32>
    %254 = tpu.matmul %252, %253, %cst_145 {dimension_numbers = #tpu.dot_dimension_numbers<[1], [0], [0], [1], [0, 0, 1, 1], [], []>} : vector<2x64xf32>, vector<64x32xf32>, vector<2x32xf32> -> vector<2x32xf32>
    %255 = arith.addf %251, %254 : vector<2x32xf32>
    %c0_146 = arith.constant 0 : index
    %c0_147 = arith.constant 0 : index
    %256 = vector.load %arg14[%c0_146, %c0_147] : memref<1x32xf32, #tpu.memory_space<vmem>>, vector<1x32xf32>
    %257 = vector.broadcast %256 : vector<1x32xf32> to vector<2x32xf32>
    %258 = arith.addf %255, %257 : vector<2x32xf32>
    %cst_148 = arith.constant 0.000000e+00 : f32
    %259 = vector.broadcast %cst_148 : f32 to vector<2x32xf32>
    %260 = arith.maximumf %258, %259 : vector<2x32xf32>
    %c0_149 = arith.constant 0 : index
    %c0_150 = arith.constant 0 : index
    %261 = vector.load %arg15[%c0_149, %c0_150] : memref<32x10xf32, #tpu.memory_space<vmem>>, vector<32x10xf32>
    %cst_151 = arith.constant dense<0.000000e+00> : vector<2x10xf32>
    %262 = tpu.matmul %260, %261, %cst_151 {dimension_numbers = #tpu.dot_dimension_numbers<[1], [0], [0], [1], [0, 0, 1, 1], [], []>} : vector<2x32xf32>, vector<32x10xf32>, vector<2x10xf32> -> vector<2x10xf32>
    %c0_152 = arith.constant 0 : index
    %c0_153 = arith.constant 0 : index
    %263 = vector.load %arg16[%c0_152, %c0_153] : memref<1x10xf32, #tpu.memory_space<vmem>>, vector<1x10xf32>
    %264 = vector.broadcast %263 : vector<1x10xf32> to vector<2x10xf32>
    %265 = arith.addf %262, %264 : vector<2x10xf32>
    %cst_154 = arith.constant dense<0xFF800000> : vector<2xf32>
    %266 = vector.multi_reduction <maximumf>, %265, %cst_154 [1] : vector<2x10xf32> to vector<2xf32>
    %267 = vector.shape_cast %266 : vector<2xf32> to vector<2x1xf32>
    %268 = vector.broadcast %267 : vector<2x1xf32> to vector<2x10xf32>
    %269 = arith.subf %265, %268 : vector<2x10xf32>
    %270 = math.exp %269 : vector<2x10xf32>
    %cst_155 = arith.constant dense<0.000000e+00> : vector<2xf32>
    %271 = vector.multi_reduction <add>, %270, %cst_155 [1] : vector<2x10xf32> to vector<2xf32>
    %272 = vector.shape_cast %271 : vector<2xf32> to vector<2x1xf32>
    %273 = math.log %272 : vector<2x1xf32>
    %274 = vector.broadcast %273 : vector<2x1xf32> to vector<2x10xf32>
    %275 = arith.subf %269, %274 : vector<2x10xf32>
    %c0_156 = arith.constant 0 : index
    %c0_157 = arith.constant 0 : index
    %276 = vector.load %arg17[%c0_156, %c0_157] : memref<2x10xf32, #tpu.memory_space<vmem>>, vector<2x10xf32>
    tpu.vector_store %arg17[%c0_156, %c0_157], %275 {strides = array<i32>} : memref<2x10xf32, #tpu.memory_space<vmem>>, vector<2x10xf32>,
    return
  }
}

</mosaic_0001>

<bundles_post_ra>
// kernel: forward.1
= control target key start
LH: loop header
LB: loop body
LE: loop exit
PB: predicated region body
PF: predicated region fallthrough
CT: control target
= control target key end

     0   :  { %s5009_s0 = inlined_call_operand.vmem [shape: f32[2,4,16,16], index: 0, kind: input, shape index: {}]   ;;  %s5010_s1 = inlined_call_operand.vmem [shape: f32[3,64,128], index: 1, kind: input, shape index: {}]   ;;  %s5011_s2 = inlined_call_operand.vmem [shape: f32[1,128], index: 2, kind: input, shape index: {}]   ;;  %s5012_s3 = inlined_call_operand.vmem [shape: f32[3,128,128], index: 3, kind: input, shape index: {}]   ;;  %s5013_s4 = inlined_call_operand.vmem [shape: f32[1,128], index: 4, kind: input, shape index: {}]   ;;  %s5014_s5 = inlined_call_operand.vmem [shape: f32[1,128], index: 5, kind: input, shape index: {}]   ;;  %s5015_s6 = inlined_call_operand.vmem [shape: f32[1,128], index: 6, kind: input, shape index: {}]   ;;  %s5016_s7 = inlined_call_operand.vmem [shape: f32[3,128,64], index: 7, kind: input, shape index: {}]   ;;  %s5017_s8 = inlined_call_operand.vmem [shape: f32[1,64], index: 8, kind: input, shape index: {}]   ;;  %s5018_s9 = inlined_call_operand.vmem [shape: f32[3,64,64], index: 9, kind: input, shape index: {}]   ;;  %s5019_s10 = inlined_call_operand.vmem [shape: f32[1,64], index: 10, kind: input, shape index: {}]   ;;  %s5020_s11 = inlined_call_operand.vmem [shape: f32[1,64], index: 11, kind: input, shape index: {}]   ;;  %s5021_s12 = inlined_call_operand.vmem [shape: f32[1,64], index: 12, kind: input, shape index: {}]   ;;  %s5022_s13 = inlined_call_operand.vmem [shape: f32[512,32], index: 13, kind: input, shape index: {}]   ;;  %s5023_s14 = inlined_call_operand.vmem [shape: f32[1,32], index: 14, kind: input, shape index: {}]   ;;  %s5024_s15 = inlined_call_operand.vmem [shape: f32[32,10], index: 15, kind: input, shape index: {}]   ;;  %s5025_s16 = inlined_call_operand.vmem [shape: f32[1,10], index: 16, kind: input, shape index: {}]   ;;  %s5026_s17 = inlined_call_operand.hbm [shape: f32[2,10], index: 17, kind: output, shape index: {}]  }
   0x1   :  { %5029 = sst [smem:[#allocation7_spill]] %s5009_s0 }
   0x2   :  { %5030 = sst [smem:[#allocation8_spill]] %s5010_s1 }
   0x3   :  { %s5031_s26 = sld [smem:[#allocation7_spill]]  ;;  %s3854_s29 = smov 32  }
   0x4   :  { %s3855_s0 = smov 16   ;;  %s5032_s22 = sld [smem:[#allocation8_spill]] }
   0x5   :  { %s3856_s27 = smov 48  }
   0x9   :  { %v61_v0 = vld [vmem:[%s5031_s26 + $0x20] sm:$0xff]  ;;  %v59_v1 = vld [vmem:[%s5031_s26 + $0x10] sm:$0xff]  ;;  %v62_v2 = vld [vmem:[%s5031_s26 + $0x28] sm:$0xff] }
   0xa   :  { %93 = vrot.lane.b32.xlu1 %v61_v0, %s3854_s29  ;;  %77 = vrot.lane.b32.xlu0 %v59_v1, %s3855_s0  ;;  %v60_v3 = vld [vmem:[%s5031_s26 + $0x18] sm:$0xff]  ;;  %v2488_v4 = vld [vmem:[%s5032_s22 + $0x40] sm:$0xff] }
   0xb   :  { %v2489_v5 = vld [vmem:[%s5032_s22 + $0x48] sm:$0xff]  ;;  %v2490_v7 = vld [vmem:[%s5032_s22 + $0x50] sm:$0xff]  ;;  %v2491_v8 = vld [vmem:[%s5032_s22 + $0x58] sm:$0xff] }
   0xc   :  { %v3395_v6 = vpack.c.bf16 %v2489_v5, %v2488_v4  ;;  %v64_v9 = vld [vmem:[%s5031_s26 + $0x38] sm:$0xff]  ;;  %v63_v10 = vld [vmem:[%s5031_s26 + $0x30] sm:$0xff]  ;;  %v3399_v11 = vpack.c.bf16 %v2491_v8, %v2490_v7  ;;  %v2492_v12 = vld [vmem:[%s5032_s22 + $0x60] sm:$0xff] }
   0xd   :  { %v2493_v13 = vld [vmem:[%s5032_s22 + $0x68] sm:$0xff]  ;;  %v68_v14 = vld [vmem:[%s5031_s26 + $0x58] sm:$0xff]  ;;  %v67_v15 = vld [vmem:[%s5031_s26 + $0x50] sm:$0xff] }
   0xe   :  { %95 = vrot.lane.b32.xlu1 %v62_v2, %s3854_s29  ;;  %79 = vrot.lane.b32.xlu0 %v60_v3, %s3855_s0  ;;  %v3403_v16 = vpack.c.bf16 %v2493_v13, %v2492_v12  ;;  %v2494_v17 = vld [vmem:[%s5032_s22 + $0x70] sm:$0xff]  ;;  %v2495_v18 = vld [vmem:[%s5032_s22 + $0x78] sm:$0xff] }
   0xf   :  { %3396 = vmatprep.subr.bf16.mxu0 %v3395_v6 }
  0x10   :  { %3398 = vmatpush3.bf16.msra.mxu0 %v3395_v6 }
  0x11   :  { %3400 = vmatprep.subr.bf16.mxu0 %v3399_v11 }
  0x12   :  { %111 = vrot.lane.b32.xlu1 %v64_v9, %s3856_s27  ;;  %109 = vrot.lane.b32.xlu0 %v63_v10, %s3856_s27 }
  0x14   :  { %3402 = vmatpush3.bf16.msra.mxu0 %v3399_v11 }
  0x15   :  { %22 = vsyncpa [#allocation5], 0  ;;  %v70_v19 = vld [vmem:[%s5031_s26 + $0x68] sm:$0xff]  ;;  %v69_v20 = vld [vmem:[%s5031_s26 + $0x60] sm:$0xff]  ;;  %3404 = vmatprep.subr.bf16.mxu0 %v3403_v16  ;;  %v3407_v21 = vpack.c.bf16 %v2495_v18, %v2494_v17  ;;  %vm121_vm0 = vcmask 130048   ;;  %vm126_vm1 = vcmask 261120   ;;  %v136_v58 = vlaneseq }
  0x16   :  { %83 = vrot.lane.b32.xlu1 %v68_v14, %s3855_s0  ;;  %81 = vrot.lane.b32.xlu0 %v67_v15, %s3855_s0  ;;  %v191_v22 = vld [vmem:[%s5032_s22] sm:$0xff]  ;;  %v192_v23 = vld [vmem:[%s5032_s22 + $0x8] sm:$0xff]  ;;  %vm131_vm2 = vcmask 392192   ;;  %vm208_vm3 = vcmask 523264   ;;  %vm153_vm4 = vcmask 1040384   ;;  %vm174_vm7 = vcmask 1046528  }
  0x17   :  { %v72_v24 = vld [vmem:[%s5031_s26 + $0x78] sm:$0xff]  ;;  %v71_v25 = vld [vmem:[%s5031_s26 + $0x70] sm:$0xff]  ;;  %v4031_v26 = vpack.c.bf16 %v192_v23, %v191_v22  ;;  %v2517_v27 = vld [vmem:[%s5012_s3 + $0x80] sm:$0xff]  ;;  %v4108_v4 = vshrl.u32 %v136_v58, 7  ;;  %s3859_s28 = smov 120   ;;  %s3862_s24 = smov 96  }
  0x18   :  { %3406 = vmatpush3.bf16.msra.mxu0 %v3403_v16  ;;  %v2518_v28 = vld [vmem:[%s5012_s3 + $0x88] sm:$0xff]  ;;  %v2519_v29 = vld [vmem:[%s5012_s3 + $0x90] sm:$0xff]  ;;  %v2520_v31 = vld [vmem:[%s5012_s3 + $0x98] sm:$0xff] }
  0x19   :  { %3408 = vmatprep.subr.bf16.mxu0 %v3407_v21  ;;  %v3443_v30 = vpack.c.bf16 %v2518_v28, %v2517_v27  ;;  %v3447_v32 = vpack.c.bf16 %v2520_v31, %v2519_v29  ;;  %v2521_v33 = vld [vmem:[%s5012_s3 + $0xa0] sm:$0xff]  ;;  %v2522_v34 = vld [vmem:[%s5012_s3 + $0xa8] sm:$0xff]  ;;  %v2523_v36 = vld [vmem:[%s5012_s3 + $0xb0] sm:$0xff]  ;;  %v141_v10 = vand.u32 15, %v4108_v4  ;;  %v139_v16 = vadd.s32 16, %v4108_v4 }
  0x1a   :  { %99 = vrot.lane.b32.xlu1 %v70_v19, %s3854_s29  ;;  %97 = vrot.lane.b32.xlu0 %v69_v20, %s3854_s29  ;;  %v3451_v35 = vpack.c.bf16 %v2522_v34, %v2521_v33  ;;  %v2524_v37 = vld [vmem:[%s5012_s3 + $0xb8] sm:$0xff]  ;;  %v2525_v39 = vld [vmem:[%s5012_s3 + $0xc0] sm:$0xff] }
  0x1b   :  { %3444 = vmatprep.subr.bf16.mxu1 %v3443_v30  ;;  %v3455_v38 = vpack.c.bf16 %v2524_v37, %v2523_v36  ;;  %v2526_v40 = vld [vmem:[%s5012_s3 + $0xc8] sm:$0xff]  ;;  %v2527_v42 = vld [vmem:[%s5012_s3 + $0xd0] sm:$0xff]  ;;  %v2528_v43 = vld [vmem:[%s5012_s3 + $0xd8] sm:$0xff]  ;;  %vm4134_vm5 = vcmp.eq.s32.totalorder %v141_v10, 0  ;;  %v143_v28 = vand.u32 15, %v139_v16 }
  0x1c   :  { %3410 = vmatpush3.bf16.msra.mxu0 %v3407_v21  ;;  %3446 = vmatpush3.bf16.msra.mxu1 %v3443_v30  ;;  %v3459_v41 = vpack.c.bf16 %v2526_v40, %v2525_v39  ;;  %v3463_v44 = vpack.c.bf16 %v2528_v43, %v2527_v42  ;;  %v2529_v45 = vld [vmem:[%s5012_s3 + $0xe0] sm:$0xff]  ;;  %v2530_v46 = vld [vmem:[%s5012_s3 + $0xe8] sm:$0xff]  ;;  %v193_v56 = vld [vmem:[%s5032_s22 + $0x10] sm:$0xff] }
  0x1d   :  { %3412 = vmatprep.subr.bf16.mxu0 %v4031_v26  ;;  %3448 = vmatprep.subr.bf16.mxu1 %v3447_v32  ;;  %v3467_v47 = vpack.c.bf16 %v2530_v46, %v2529_v45  ;;  %v57_v50 = vld [vmem:[%s5031_s26] sm:$0xff]  ;;  %v58_v51 = vld [vmem:[%s5031_s26 + $0x8] sm:$0xff]  ;;  %v194_v57 = vld [vmem:[%s5032_s22 + $0x18] sm:$0xff]  ;;  %vm4155_vm6 = vcmp.eq.s32.totalorder %v143_v28, 0 }
  0x1e   :  { %115 = vrot.lane.b32.xlu1 %v72_v24, %s3856_s27  ;;  %113 = vrot.lane.b32.xlu0 %v71_v25, %s3856_s27  ;;  %v3415_v1 = vpack.c.bf16 %v194_v57, %v193_v56  ;;  %v195_v2 = vld [vmem:[%s5032_s22 + $0x20] sm:$0xff]  ;;  %v196_v3 = vld [vmem:[%s5032_s22 + $0x28] sm:$0xff]  ;;  %v140_v56 = vadd.s32 24, %v4108_v4  ;;  %vm2533_vm10 = vmneg %vm4134_vm5 }
  0x1f   :  { %v3419_v7 = vpack.c.bf16 %v196_v3, %v195_v2  ;;  %v197_v8 = vld [vmem:[%s5032_s22 + $0x30] sm:$0xff]  ;;  %v198_v9 = vld [vmem:[%s5032_s22 + $0x38] sm:$0xff]  ;;  %v66_v12 = vld [vmem:[%s5031_s26 + $0x48] sm:$0xff] }
  0x20   :  { %3450 = vmatpush3.bf16.msra.mxu1 %v3447_v32  ;;  %v65_v13 = vld [vmem:[%s5031_s26 + $0x40] sm:$0xff]  ;;  %v3423_v17 = vpack.c.bf16 %v198_v9, %v197_v8  ;;  %v2505_v19 = vld [vmem:[%s5032_s22 + $0x88] sm:$0xff]  ;;  %v2506_v34 = vld [vmem:[%s5032_s22 + $0x90] sm:$0xff]  ;;  %s3858_s26 = smov 64  }
  0x21   :  { %3452 = vmatprep.subr.bf16.mxu1 %v3451_v35  ;;  %v2504_v18 = vld [vmem:[%s5032_s22 + $0x80] sm:$0xff]  ;;  %v2509_v43 = vld [vmem:[%s5032_s22 + $0xa8] sm:$0xff]  ;;  %v2531_v2 = vld [vmem:[%s5012_s3 + $0xf0] sm:$0xff] }
  0x22   :  { %v3427_v31 = vpack.c.bf16 %v2505_v19, %v2504_v18  ;;  %v2508_v42 = vld [vmem:[%s5032_s22 + $0xa0] sm:$0xff]  ;;  %v2532_v3 = vld [vmem:[%s5012_s3 + $0xf8] sm:$0xff]  ;;  %vm2535_vm11 = vmneg %vm4155_vm6 }
  0x23   :  { %v2516_v9 = vld [vmem:[%s5011_s2] ss:$0 sm:$0xff]  ;;  %v2544_v37 = vld [vmem:[%s5012_s3 + $0x138] sm:$0xff] }
  0x24   :  { %3454 = vmatpush3.bf16.msra.mxu1 %v3451_v35  ;;  %v2507_v35 = vld [vmem:[%s5032_s22 + $0x98] sm:$0xff] }
  0x25   :  { %3456 = vmatprep.subr.bf16.mxu1 %v3455_v38  ;;  %v3431_v39 = vpack.c.bf16 %v2507_v35, %v2506_v34  ;;  %v562_v35 = vld [vmem:[%s5012_s3 + $0x30] sm:$0xff] }
  0x28   :  { %3458 = vmatpush3.bf16.msra.mxu1 %v3455_v38 }
  0x29   :  { %3460 = vmatprep.subr.bf16.mxu1 %v3459_v41 }
  0x2c   :  { %3462 = vmatpush3.bf16.msra.mxu1 %v3459_v41 }
  0x2d   :  { %3464 = vmatprep.subr.bf16.mxu1 %v3463_v44 }
  0x30   :  { %3466 = vmatpush3.bf16.msra.mxu1 %v3463_v44 }
  0x31   :  { %3468 = vmatprep.subr.bf16.mxu1 %v3467_v47 }
  0x34   :  { %3470 = vmatpush3.bf16.msra.mxu1 %v3467_v47  ;;  %v3435_v47 = vpack.c.bf16 %v2509_v43, %v2508_v42  ;;  %v564_v43 = vld [vmem:[%s5012_s3 + $0x40] sm:$0xff] }
  0x7c   :  { %v94_v48 = vpop.permute.xlu1 %93  ;;  %v78_v49 = vpop.permute.xlu0 %77 }
  0x7d   :  { %v122_v54 = vsel %vm121_vm0, %v57_v50, %v78_v49  ;;  %v2510_v49 = vld [vmem:[%s5032_s22 + $0xb0] sm:$0xff]  ;;  %v2511_v50 = vld [vmem:[%s5032_s22 + $0xb8] sm:$0xff] }
  0x7e   :  { %v127_v62 = vsel %vm126_vm1, %v122_v54, %v94_v48 }
  0x80   :  { %v96_v52 = vpop.permute.xlu1 %95  ;;  %v80_v53 = vpop.permute.xlu0 %79 }
  0x81   :  { %v123_v55 = vsel %vm121_vm0, %v58_v51, %v80_v53  ;;  %v3439_v53 = vpack.c.bf16 %v2511_v50, %v2510_v49  ;;  %v568_v49 = vld [vmem:[%s5012_s3 + $0x60] sm:$0xff]  ;;  %v569_v50 = vld [vmem:[%s5012_s3 + $0x68] sm:$0xff] }
  0x82   :  { %v128_v60 = vsel %vm126_vm1, %v123_v55, %v96_v52  ;;  %v4183_v52 = vadd.s32 8, %v4108_v4 }
  0x84   :  { %v112_v59 = vpop.permute.xlu1 %111  ;;  %v110_v61 = vpop.permute.xlu0 %109  ;;  %v142_v55 = vand.u32 15, %v4183_v52 }
  0x85   :  { %v4093_v63 = vsel %vm131_vm2, %v128_v60, %v112_v59  ;;  %v4096_v0 = vsel %vm131_vm2, %v127_v62, %v110_v61  ;;  %v144_v60 = vand.u32 15, %v140_v56  ;;  %v2537_v56 = vld [vmem:[%s5012_s3 + $0x100] sm:$0xff] }
  0x86   :  { %2906 = vmatprep.mubr.msk.f32.mxu0 %vm208_vm3, %v4096_v0  ;;  %v154_v11 = vrot.slane %v4096_v0, 7  ;;  %v155_v32 = vrot.slane %v4093_v63, 7  ;;  %v176_v44 = vrot.slane %v4093_v63, 1  ;;  %v175_v45 = vrot.slane %v4096_v0, 1 }
  0x87   :  { %2907 = vmatmul.mubr.msk.f32.vlgmr.msra.gmra.mrb[0].mxu0 %vm208_vm3, %v4093_v63  ;;  %vm4189_vm8 = vcmp.eq.s32.totalorder %v142_v55, 15  ;;  %vm4197_vm9 = vcmp.eq.s32.totalorder %v144_v60, 15  ;;  %v2539_v60 = vld [vmem:[%s5012_s3 + $0x110] sm:$0xff] }
  0x88   :  { %3414 = vmatpush3.bf16.msra.mxu0 %v4031_v26  ;;  %v84_v5 = vpop.permute.xlu1 %83  ;;  %v82_v6 = vpop.permute.xlu0 %81  ;;  %v165_v27 = vsel %vm153_vm4, 0.0, %v154_v11  ;;  %v156_v41 = vsel %vm153_vm4, %v154_v11, %v155_v32  ;;  %v177_v51 = vsel %vm174_vm7, %v175_v45, %v176_v44  ;;  %v558_v11 = vld [vmem:[%s5012_s3 + $0x10] sm:$0xff]  ;;  %vm2553_vm12 = vmneg %vm4189_vm8 }
  0x89   :  { %3416 = vmatprep.subr.bf16.mxu0 %v3415_v1  ;;  %v125_v20 = vsel %vm121_vm0, %v66_v12, %v84_v5  ;;  %v124_v21 = vsel %vm121_vm0, %v65_v13, %v82_v6  ;;  %v166_v36 = vsel %vm4134_vm5, 0.0, %v165_v27  ;;  %v3471_v5 = vpack.c.bf16 %v2532_v3, %v2531_v2  ;;  %v556_v6 = vld [vmem:[%s5012_s3] sm:$0xff]  ;;  %v559_v12 = vld [vmem:[%s5012_s3 + $0x18] sm:$0xff]  ;;  %v2543_v3 = vld [vmem:[%s5012_s3 + $0x130] sm:$0xff] }
  0x8a   :  { %v3479_v18 = vpack.c.bf16 %v559_v12, %v558_v11  ;;  %v2549_v12 = vld [vmem:[%s5012_s3 + $0x160] sm:$0xff]  ;;  %vm2555_vm13 = vmneg %vm4197_vm9 }
  0x8b   :  { %3472 = vmatprep.subr.bf16.mxu1 %v3471_v5 }
  0x8c   :  { %3418 = vmatpush3.bf16.msra.mxu0 %v3415_v1  ;;  %v100_v14 = vpop.permute.xlu1 %99  ;;  %v98_v15 = vpop.permute.xlu0 %97  ;;  %3474 = vmatpush3.bf16.msra.mxu1 %v3471_v5  ;;  %v3519_v5 = vpack.c.bf16 %v2544_v37, %v2543_v3  ;;  %v2558_v37 = vld [vmem:[%s5016_s7 + $0x80] sm:$0xff] }
  0x8d   :  { %3420 = vmatprep.subr.bf16.mxu0 %v3419_v7  ;;  %v130_v23 = vsel %vm126_vm1, %v125_v20, %v100_v14  ;;  %v129_v24 = vsel %vm126_vm1, %v124_v21, %v98_v15 }
  0x90   :  { %3422 = vmatpush3.bf16.msra.mxu0 %v3419_v7  ;;  %v116_v25 = vpop.permute.xlu1 %115  ;;  %v114_v26 = vpop.permute.xlu0 %113  ;;  %v557_v7 = vld [vmem:[%s5012_s3 + $0x8] sm:$0xff] }
  0x91   :  { %v135_v29 = vsel %vm131_vm2, %v130_v23, %v116_v25  ;;  %v134_v30 = vsel %vm131_vm2, %v129_v24, %v114_v26  ;;  %3424 = vmatprep.subr.bf16.mxu0 %v3423_v17  ;;  %v3475_v8 = vpack.c.bf16 %v557_v7, %v556_v6  ;;  %v560_v23 = vld [vmem:[%s5012_s3 + $0x20] sm:$0xff]  ;;  %v561_v24 = vld [vmem:[%s5012_s3 + $0x28] sm:$0xff] }
  0x92   :  { %v157_v33 = vrot.slane %v134_v30, 7  ;;  %2909 = vmatprep.mubr.msk.f32.mxu0 %vm208_vm3, %v134_v30  ;;  %v159_v40 = vrot.slane %v135_v29, 7  ;;  %v178_v54 = vrot.slane %v134_v30, 1  ;;  %v180_v57 = vrot.slane %v135_v29, 1  ;;  %v2545_v6 = vld [vmem:[%s5012_s3 + $0x140] sm:$0xff]  ;;  %v2546_v7 = vld [vmem:[%s5012_s3 + $0x148] sm:$0xff] }
  0x93   :  { %2910 = vmatmul.mubr.msk.f32.gmra.mrb[2].mxu0 %vm208_vm3, %v135_v29  ;;  %3476 = vmatprep.subr.bf16.mxu1 %v3475_v8 }
  0x94   :  { %3426 = vmatpush3.bf16.msra.mxu0 %v3423_v17  ;;  %2928 = vmatprep.mubr.msk.f32.mxu0 %vm208_vm3, %v166_v36  ;;  %v158_v38 = vsel %vm153_vm4, %v155_v32, %v157_v33  ;;  %v160_v48 = vsel %vm153_vm4, %v157_v33, %v159_v40  ;;  %v179_v58 = vsel %vm174_vm7, %v176_v44, %v178_v54  ;;  %v186_v0 = vsel %vm174_vm7, %v180_v57, 0.0  ;;  %v563_v36 = vld [vmem:[%s5012_s3 + $0x38] sm:$0xff]  ;;  %v565_v44 = vld [vmem:[%s5012_s3 + $0x48] sm:$0xff] }
  0x95   :  { %3428 = vmatprep.subr.bf16.mxu0 %v3427_v31  ;;  %v168_v46 = vsel %vm4155_vm6, 0.0, %v158_v38  ;;  %v188_v61 = vsel %vm4189_vm8, 0.0, %v179_v58  ;;  %v181_v62 = vsel %vm174_vm7, %v178_v54, %v180_v57  ;;  %v190_v1 = vsel %vm4197_vm9, 0.0, %v186_v0  ;;  %v571_v54 = vld [vmem:[%s5012_s3 + $0x78] sm:$0xff]  ;;  %v2538_v57 = vld [vmem:[%s5012_s3 + $0x108] sm:$0xff]  ;;  %v2541_v0 = vld [vmem:[%s5012_s3 + $0x120] sm:$0xff] }
  0x96   :  { %v3483_v32 = vpack.c.bf16 %v561_v24, %v560_v23  ;;  %v3491_v45 = vpack.c.bf16 %v565_v44, %v564_v43  ;;  %v3507_v58 = vpack.c.bf16 %v2538_v57, %v2537_v56 }
  0x97   :  { %2929 = vmatmul.mubr.msk.f32.vlgmr.msra.gmra.mrb[0].mxu0 %vm208_vm3, %v156_v41  ;;  %v3487_v41 = vpack.c.bf16 %v563_v36, %v562_v35 }
  0x98   :  { %3430 = vmatpush3.bf16.msra.mxu0 %v3427_v31  ;;  %2931 = vmatprep.mubr.msk.f32.mxu0 %vm208_vm3, %v168_v46  ;;  %v566_v46 = vld [vmem:[%s5012_s3 + $0x50] sm:$0xff] }
  0x99   :  { %3432 = vmatprep.subr.bf16.mxu0 %v3431_v39 }
  0x9b   :  { %2932 = vmatmul.mubr.msk.f32.gmra.mrb[2].mxu0 %vm208_vm3, %v160_v48 }
  0x9c   :  { %3434 = vmatpush3.bf16.msra.mxu0 %v3431_v39  ;;  %2950 = vmatprep.mubr.msk.f32.mxu0 %vm208_vm3, %v177_v51  ;;  %v3499_v51 = vpack.c.bf16 %v569_v50, %v568_v49 }
  0x9d   :  { %3436 = vmatprep.subr.bf16.mxu0 %v3435_v47 }
  0xa0   :  { %3438 = vmatpush3.bf16.msra.mxu0 %v3435_v47  ;;  %v567_v47 = vld [vmem:[%s5012_s3 + $0x58] sm:$0xff] }
  0xa1   :  { %3440 = vmatprep.subr.bf16.mxu0 %v3439_v53  ;;  %v3495_v48 = vpack.c.bf16 %v567_v47, %v566_v46 }
  0xa4   :  { %3442 = vmatpush3.bf16.msra.mxu0 %v3439_v53  ;;  %v570_v53 = vld [vmem:[%s5012_s3 + $0x70] sm:$0xff] }
  0xa5   :  { %v3503_v55 = vpack.c.bf16 %v571_v54, %v570_v53 }
  0xa7   :  { %2951 = vmatmul.mubr.msk.f32.vlgmr.msra.gmra.mrb[0].mxu0 %vm208_vm3, %v188_v61  ;;  %v2540_v61 = vld [vmem:[%s5012_s3 + $0x118] sm:$0xff] }
  0xa8   :  { %2953 = vmatprep.mubr.msk.f32.mxu0 %vm208_vm3, %v181_v62  ;;  %v3511_v62 = vpack.c.bf16 %v2540_v61, %v2539_v60 }
  0xab   :  { %2954 = vmatmul.mubr.msk.f32.gmra.mrb[2].mxu0 %vm208_vm3, %v190_v1  ;;  %v2542_v1 = vld [vmem:[%s5012_s3 + $0x128] sm:$0xff] }
  0xac   :  { %v3515_v2 = vpack.c.bf16 %v2542_v1, %v2541_v0 }
 0x17a   :  { %v2952_v10 = vpop.f32.mrb[0].mxu0 }
 0x17b   :  { %v517_v13 = vadd.f32 %v2952_v10, %v2516_v9  ;;  %v486_v14 = vpop.f32.mrb[1].mxu0  ;;  %v2548_v10 = vld [vmem:[%s5012_s3 + $0x158] sm:$0xff] }
 0x17c   :  { %v516_v15 = vadd.f32 %v2516_v9, %v486_v14 }
 0x17d   :  { %v525_v16 = vrot.slane %v517_v13, 7  ;;  %v541_v17 = vrot.slane %v517_v13, 1 }
 0x17e   :  { %v524_v19 = vrot.slane %v516_v15, 7  ;;  %v540_v20 = vrot.slane %v516_v15, 1  ;;  %v2955_v21 = vpop.f32.mrb[2].mxu0  ;;  %2988 = vmatprep.mubr.f32.mxu1 %v516_v15  ;;  %v2551_v15 = vld [vmem:[%s5012_s3 + $0x170] sm:$0xff] }
 0x17f   :  { %v4233_v25 = vadd.f32 %v2955_v21, %v2516_v9  ;;  %v496_v26 = vpop.f32.mrb[3].mxu0  ;;  %2989 = vmatmul.mubr.f32.vlgmr.msra.gmra.mrb[0].mxu1 %v517_v13  ;;  %v2550_v13 = vld [vmem:[%s5012_s3 + $0x168] sm:$0xff] }
 0x180   :  { %v518_v27 = vadd.f32 %v2516_v9, %v496_v26  ;;  %3478 = vmatpush3.bf16.msra.mxu1 %v3475_v8  ;;  %v526_v28 = vsel %vm153_vm4, %v524_v19, %v525_v16  ;;  %v542_v29 = vsel %vm174_vm7, %v540_v20, %v541_v17  ;;  %v535_v38 = vsel %vm153_vm4, 0.0, %v524_v19  ;;  %v2547_v9 = vld [vmem:[%s5012_s3 + $0x150] sm:$0xff]  ;;  %v2557_v19 = vld [vmem:[%s5013_s4] ss:$0 sm:$0xff]  ;;  %s3857_s4 = smov 8  }
 0x181   :  { %v529_v30 = vrot.slane %v4233_v25, 7  ;;  %v545_v31 = vrot.slane %v4233_v25, 1  ;;  %3480 = vmatprep.subr.bf16.mxu1 %v3479_v18  ;;  %v3523_v8 = vpack.c.bf16 %v2546_v7, %v2545_v6  ;;  %v3527_v11 = vpack.c.bf16 %v2548_v10, %v2547_v9  ;;  %v2560_v6 = vld [vmem:[%s5016_s7 + $0x90] sm:$0xff]  ;;  %v2562_v10 = vld [vmem:[%s5016_s7 + $0xa0] sm:$0xff] }
 0x182   :  { %v527_v33 = vrot.slane %v518_v27, 7  ;;  %v543_v34 = vrot.slane %v518_v27, 1  ;;  %2991 = vmatprep.mubr.f32.mxu1 %v518_v27  ;;  %v3531_v14 = vpack.c.bf16 %v2550_v13, %v2549_v12  ;;  %v2564_v13 = vld [vmem:[%s5016_s7 + $0xb0] sm:$0xff] }
 0x183   :  { %2992 = vmatmul.mubr.f32.gmra.mrb[2].mxu1 %v4233_v25 }
 0x184   :  { %3482 = vmatpush3.bf16.msra.mxu1 %v3479_v18  ;;  %3026 = vmatprep.mubr.msk.f32.mxu1 %vm2533_vm10, %v535_v38  ;;  %v528_v22 = vsel %vm153_vm4, %v525_v16, %v527_v33  ;;  %v530_v39 = vsel %vm153_vm4, %v527_v33, %v529_v30  ;;  %v4252_v40 = vsel %vm174_vm7, %v541_v17, %v543_v34  ;;  %v2552_v16 = vld [vmem:[%s5012_s3 + $0x178] sm:$0xff]  ;;  %v551_v18 = vsel %vm174_vm7, %v545_v31, 0.0 }
 0x185   :  { %3484 = vmatprep.subr.bf16.mxu1 %v3483_v32  ;;  %v4257_v42 = vsel %vm174_vm7, %v543_v34, %v545_v31  ;;  %v3535_v17 = vpack.c.bf16 %v2552_v16, %v2551_v15  ;;  %v2566_v16 = vld [vmem:[%s5016_s7 + $0xc0] sm:$0xff] }
 0x188   :  { %3486 = vmatpush3.bf16.msra.mxu1 %v3483_v32 }
 0x189   :  { %3488 = vmatprep.subr.bf16.mxu1 %v3487_v41 }
 0x18c   :  { %3490 = vmatpush3.bf16.msra.mxu1 %v3487_v41 }
 0x18d   :  { %3492 = vmatprep.subr.bf16.mxu1 %v3491_v45 }
 0x190   :  { %3494 = vmatpush3.bf16.msra.mxu1 %v3491_v45 }
 0x191   :  { %3496 = vmatprep.subr.bf16.mxu1 %v3495_v48 }
 0x194   :  { %3498 = vmatpush3.bf16.msra.mxu1 %v3495_v48 }
 0x195   :  { %3500 = vmatprep.subr.bf16.mxu1 %v3499_v51 }
 0x198   :  { %3502 = vmatpush3.bf16.msra.mxu1 %v3499_v51 }
 0x199   :  { %3504 = vmatprep.subr.bf16.mxu1 %v3503_v55 }
 0x19c   :  { %3506 = vmatpush3.bf16.msra.mxu1 %v3503_v55 }
 0x19d   :  { %3508 = vmatprep.subr.bf16.mxu1 %v3507_v58 }
 0x19f   :  { %3027 = vmatmul.mubr.f32.vlgmr.msra.gmra.mrb[0].mxu1 %v526_v28 }
 0x1a0   :  { %3029 = vmatprep.mubr.msk.f32.mxu1 %vm2535_vm11, %v528_v22  ;;  %3510 = vmatpush3.bf16.msra.mxu1 %v3507_v58 }
 0x1a1   :  { %3512 = vmatprep.subr.bf16.mxu1 %v3511_v62 }
 0x1a3   :  { %3030 = vmatmul.mubr.f32.gmra.mrb[2].mxu1 %v530_v39 }
 0x1a4   :  { %3514 = vmatpush3.bf16.msra.mxu1 %v3511_v62  ;;  %3064 = vmatprep.mubr.f32.mxu1 %v542_v29 }
 0x1a5   :  { %3516 = vmatprep.subr.bf16.mxu1 %v3515_v2 }
 0x1a8   :  { %3518 = vmatpush3.bf16.msra.mxu1 %v3515_v2 }
 0x1a9   :  { %3520 = vmatprep.subr.bf16.mxu1 %v3519_v5 }
 0x1ac   :  { %3522 = vmatpush3.bf16.msra.mxu1 %v3519_v5  ;;  %v2559_v5 = vld [vmem:[%s5016_s7 + $0x88] sm:$0xff] }
 0x1ad   :  { %3524 = vmatprep.subr.bf16.mxu1 %v3523_v8  ;;  %v3539_v7 = vpack.c.bf16 %v2559_v5, %v2558_v37  ;;  %v2601_v37 = vld [vmem:[%s5018_s9 + $0x50] sm:$0xff] }
 0x1af   :  { %3540 = vmatprep.subr.bf16.mxu0 %v3539_v7 }
 0x1b0   :  { %3526 = vmatpush3.bf16.msra.mxu1 %v3523_v8  ;;  %v2561_v8 = vld [vmem:[%s5016_s7 + $0x98] sm:$0xff]  ;;  %3542 = vmatpush3.bf16.msra.mxu0 %v3539_v7 }
 0x1b1   :  { %3528 = vmatprep.subr.bf16.mxu1 %v3527_v11  ;;  %v3543_v9 = vpack.c.bf16 %v2561_v8, %v2560_v6  ;;  %v2602_v6 = vld [vmem:[%s5018_s9 + $0x58] sm:$0xff]  ;;  %v2603_v8 = vld [vmem:[%s5018_s9 + $0x60] sm:$0xff] }
 0x1b2   :  { %v3639_v7 = vpack.c.bf16 %v2602_v6, %v2601_v37  ;;  %v2591_v37 = vld [vmem:[%s5016_s7 + $0x168] sm:$0xff]  ;;  %v2592_v6 = vld [vmem:[%s5016_s7 + $0x170] sm:$0xff] }
 0x1b3   :  { %3544 = vmatprep.subr.bf16.mxu0 %v3543_v9 }
 0x1b4   :  { %3530 = vmatpush3.bf16.msra.mxu1 %v3527_v11  ;;  %v2563_v11 = vld [vmem:[%s5016_s7 + $0xa8] sm:$0xff]  ;;  %3546 = vmatpush3.bf16.msra.mxu0 %v3543_v9 }
 0x1b5   :  { %3532 = vmatprep.subr.bf16.mxu1 %v3531_v14  ;;  %v3547_v12 = vpack.c.bf16 %v2563_v11, %v2562_v10  ;;  %v2604_v9 = vld [vmem:[%s5018_s9 + $0x68] sm:$0xff]  ;;  %v975_v11 = vand.u32 7, %v4108_v4 }
 0x1b6   :  { %v3643_v10 = vpack.c.bf16 %v2604_v9, %v2603_v8 }
 0x1b7   :  { %3548 = vmatprep.subr.bf16.mxu0 %v3547_v12  ;;  %vm4467_vm14 = vcmp.eq.s32.totalorder %v975_v11, 0  ;;  %vm4523_vm2 = vcmp.eq.s32.totalorder %v975_v11, 7  ;;  %v2605_v11 = vld [vmem:[%s5018_s9 + $0x70] sm:$0xff] }
 0x1b8   :  { %3534 = vmatpush3.bf16.msra.mxu1 %v3531_v14  ;;  %v2565_v14 = vld [vmem:[%s5016_s7 + $0xb8] sm:$0xff]  ;;  %3550 = vmatpush3.bf16.msra.mxu0 %v3547_v12  ;;  %vm2574_vm15 = vmneg %vm4467_vm14 }
 0x1b9   :  { %3536 = vmatprep.subr.bf16.mxu1 %v3535_v17  ;;  %v3551_v15 = vpack.c.bf16 %v2565_v14, %v2564_v13  ;;  %v1001_v13 = vld [vmem:[%s5016_s7 + $0x10] sm:$0xff]  ;;  %v1002_v14 = vld [vmem:[%s5016_s7 + $0x18] sm:$0xff]  ;;  %vm2594_vm6 = vmneg %vm4523_vm2 }
 0x1bb   :  { %3552 = vmatprep.subr.bf16.mxu0 %v3551_v15 }
 0x1bc   :  { %3538 = vmatpush3.bf16.msra.mxu1 %v3535_v17  ;;  %v2567_v17 = vld [vmem:[%s5016_s7 + $0xc8] sm:$0xff]  ;;  %3554 = vmatpush3.bf16.msra.mxu0 %v3551_v15 }
 0x1bf   :  { %3065 = vmatmul.mubr.msk.f32.vlgmr.msra.gmra.mrb[0].mxu1 %vm2553_vm12, %v4252_v40 }
 0x1c0   :  { %3067 = vmatprep.mubr.f32.mxu1 %v4257_v42 }
 0x1c3   :  { %3068 = vmatmul.mubr.msk.f32.gmra.mrb[2].mxu1 %vm2555_vm13, %v551_v18  ;;  %v3555_v18 = vpack.c.bf16 %v2567_v17, %v2566_v16  ;;  %v2612_v17 = vld [vmem:[%s5018_s9 + $0x88] sm:$0xff] }
 0x1c5   :  { %3556 = vmatprep.subr.bf16.mxu0 %v3555_v18 }
 0x1c6   :  { %3558 = vmatpush3.bf16.msra.mxu0 %v3555_v18 }
 0x292   :  { %v3066_v20 = vpop.f32.mrb[0].mxu1 }
 0x293   :  { %v873_v21 = vadd.f32 %v3066_v20, %v2557_v19  ;;  %v842_v59 = vpop.f32.mrb[1].mxu1  ;;  %v2569_v20 = vld [vmem:[%s5016_s7 + $0xd8] sm:$0xff] }
 0x294   :  { %v872_v23 = vadd.f32 %v2557_v19, %v842_v59  ;;  %v2570_v59 = vld [vmem:[%s5016_s7 + $0xe0] sm:$0xff] }
 0x295   :  { %v4345_v24 = vmax.f32 %v873_v21, 0.0 }
 0x296   :  { %v4347_v26 = vmax.f32 %v872_v23, 0.0  ;;  %v3069_v27 = vpop.f32.mrb[2].mxu1  ;;  %v2571_v23 = vld [vmem:[%s5016_s7 + $0xe8] sm:$0xff] }
 0x297   :  { %v875_v63 = vadd.f32 %v3069_v27, %v2557_v19  ;;  %v852_v28 = vpop.f32.mrb[3].mxu1  ;;  %v904_v25 = vmul.f32 %v4345_v24, %v4345_v24  ;;  %v3563_v27 = vpack.c.bf16 %v2571_v23, %v2570_v59 }
 0x298   :  { %v903_v29 = vmul.f32 %v4347_v26, %v4347_v26  ;;  %v874_v30 = vadd.f32 %v2557_v19, %v852_v28  ;;  %v882_v31 = vadd.f32 %v4345_v24, %v4347_v26  ;;  %v2568_v19 = vld [vmem:[%s5016_s7 + $0xd0] sm:$0xff]  ;;  %v2573_v28 = vld [vmem:[%s5016_s7 + $0xf8] sm:$0xff] }
 0x299   :  { %v4355_v32 = vmax.f32 %v875_v63, 0.0  ;;  %v3559_v21 = vpack.c.bf16 %v2569_v20, %v2568_v19  ;;  %v2572_v63 = vld [vmem:[%s5016_s7 + $0xf0] sm:$0xff]  ;;  %v3575_v19 = vpack.c.bf16 %v1002_v14, %v1001_v13  ;;  %v1303_v14 = vld [vmem:[%s5018_s9] sm:$0xff] }
 0x29a   :  { %v4357_v33 = vmax.f32 %v874_v30, 0.0  ;;  %v907_v34 = vadd.f32 %v904_v25, %v903_v29  ;;  %v3567_v25 = vpack.c.bf16 %v2573_v28, %v2572_v63  ;;  %v1006_v63 = vld [vmem:[%s5016_s7 + $0x38] sm:$0xff] }
 0x29b   :  { %v906_v38 = vmul.f32 %v4355_v32, %v4355_v32  ;;  %3560 = vmatprep.subr.bf16.mxu0 %v3559_v21 }
 0x29c   :  { %v883_v35 = vadd.f32 %v882_v31, %v4357_v33  ;;  %v905_v36 = vmul.f32 %v4357_v33, %v4357_v33  ;;  %3562 = vmatpush3.bf16.msra.mxu0 %v3559_v21  ;;  %v1004_v21 = vld [vmem:[%s5016_s7 + $0x28] sm:$0xff] }
 0x29d   :  { %3564 = vmatprep.subr.bf16.mxu0 %v3563_v27 }
 0x29e   :  { %v884_v22 = vadd.f32 %v883_v35, %v4355_v32  ;;  %v908_v39 = vadd.f32 %v907_v34, %v905_v36 }
 0x2a0   :  { %v885_v40 = vrot.slane %v884_v22, 4  ;;  %v909_v41 = vadd.f32 %v908_v39, %v906_v38  ;;  %3566 = vmatpush3.bf16.msra.mxu0 %v3563_v27  ;;  %v1005_v27 = vld [vmem:[%s5016_s7 + $0x30] sm:$0xff] }
 0x2a1   :  { %3568 = vmatprep.subr.bf16.mxu0 %v3567_v25  ;;  %v3583_v28 = vpack.c.bf16 %v1006_v63, %v1005_v27 }
 0x2a2   :  { %v886_v42 = vadd.f32 %v885_v40, %v884_v22  ;;  %v910_v43 = vrot.slane %v909_v41, 4 }
 0x2a4   :  { %v887_v44 = vrot.slane %v886_v42, 2  ;;  %v911_v45 = vadd.f32 %v910_v43, %v909_v41  ;;  %3570 = vmatpush3.bf16.msra.mxu0 %v3567_v25  ;;  %v876_v41 = vld [vmem:[%s5014_s5] sm:$0x1] }
 0x2a5   :  { %v1007_v25 = vld [vmem:[%s5016_s7 + $0x40] sm:$0xff] }
 0x2a6   :  { %v888_v46 = vadd.f32 %v887_v44, %v886_v42  ;;  %v912_v47 = vrot.slane %v911_v45, 2  ;;  %v4423_v42 = vsub.s32 0, %v4108_v4  ;;  %v1003_v4 = vld [vmem:[%s5016_s7 + $0x20] sm:$0xff] }
 0x2a7   :  { %v3579_v23 = vpack.c.bf16 %v1004_v21, %v1003_v4  ;;  %v1306_v4 = vld [vmem:[%s5018_s9 + $0x18] sm:$0xff] }
 0x2a8   :  { %v889_v48 = vrot.slane %v888_v46, 1  ;;  %v913_v49 = vadd.f32 %v912_v47, %v911_v45  ;;  %v877_v45 = vld [vmem:[%s5015_s6] sm:$0x1] }
 0x2aa   :  { %v890_v50 = vadd.f32 %v889_v48, %v888_v46  ;;  %v914_v51 = vrot.slane %v913_v49, 1 }
 0x2ac   :  { %891 = vrot.lane.b32.xlu0 %v890_v50, %s3857_s4  ;;  %v915_v53 = vadd.f32 %v914_v51, %v913_v49 }
 0x2ae   :  { %916 = vrot.lane.b32.xlu1 %v915_v53, %s3857_s4 }
 0x31e   :  { %v892_v54 = vpop.permute.xlu0 %891 }
 0x31f   :  { %v893_v55 = vadd.f32 %v892_v54, %v890_v50 }
 0x320   :  { %v917_v56 = vpop.permute.xlu1 %916 }
 0x321   :  { %v918_v57 = vadd.f32 %v917_v56, %v915_v53  ;;  %894 = vrot.lane.b32.xlu0 %v893_v55, %s3855_s0  ;;  %v1000_v56 = vld [vmem:[%s5016_s7 + $0x8] sm:$0xff] }
 0x323   :  { %919 = vrot.lane.b32.xlu1 %v918_v57, %s3855_s0 }
 0x393   :  { %v895_v58 = vpop.permute.xlu0 %894 }
 0x394   :  { %v896_v60 = vadd.f32 %v895_v58, %v893_v55  ;;  %v999_v55 = vld [vmem:[%s5016_s7] sm:$0xff] }
 0x395   :  { %v920_v61 = vpop.permute.xlu1 %919 }
 0x396   :  { %v921_v62 = vadd.f32 %v920_v61, %v918_v57  ;;  %897 = vrot.lane.b32.xlu0 %v896_v60, %s3854_s29  ;;  %v3571_v61 = vpack.c.bf16 %v1000_v56, %v999_v55  ;;  %v2582_v56 = vld [vmem:[%s5016_s7 + $0x120] sm:$0xff] }
 0x398   :  { %922 = vrot.lane.b32.xlu1 %v921_v62, %s3854_s29  ;;  %3572 = vmatprep.subr.bf16.mxu0 %v3571_v61 }
 0x408   :  { %v898_v0 = vpop.permute.xlu0 %897 }
 0x409   :  { %v899_v1 = vadd.f32 %v898_v0, %v896_v60 }
 0x40a   :  { %v923_v2 = vpop.permute.xlu1 %922 }
 0x40b   :  { %v924_v3 = vadd.f32 %v923_v2, %v921_v62  ;;  %900 = vrot.lane.b32.xlu0 %v899_v1, %s3858_s26  ;;  %v2599_v2 = vld [vmem:[%s5018_s9 + $0x40] sm:$0xff] }
 0x40d   :  { %925 = vrot.lane.b32.xlu1 %v924_v3, %s3858_s26 }
 0x47d   :  { %v901_v29 = vpop.permute.xlu0 %900 }
 0x47e   :  { %v902_v30 = vadd.f32 %v901_v29, %v899_v1  ;;  %v1008_v29 = vld [vmem:[%s5016_s7 + $0x48] sm:$0xff] }
 0x47f   :  { %v926_v31 = vpop.permute.xlu1 %925 }
 0x480   :  { %v928_v34 = vmul.f32 0.001953125, %v902_v30  ;;  %v927_v35 = vadd.f32 %v926_v31, %v924_v3  ;;  %v2600_v3 = vld [vmem:[%s5018_s9 + $0x48] sm:$0xff]  ;;  %v3587_v30 = vpack.c.bf16 %v1008_v29, %v1007_v25  ;;  %v1009_v31 = vld [vmem:[%s5016_s7 + $0x50] sm:$0xff] }
 0x481   :  { %v3635_v5 = vpack.c.bf16 %v2600_v3, %v2599_v2  ;;  %v2590_v3 = vld [vmem:[%s5016_s7 + $0x160] sm:$0xff] }
 0x482   :  { %v930_v36 = vmul.f32 %v928_v34, %v928_v34  ;;  %v929_v38 = vmul.f32 0.001953125, %v927_v35 }
 0x483   :  { %3636 = vmatprep.subr.bf16.mxu1 %v3635_v5 }
 0x484   :  { %v931_v22 = vsub.f32 %v929_v38, %v930_v36  ;;  %3638 = vmatpush3.bf16.msra.mxu1 %v3635_v5  ;;  %v1011_v36 = vld [vmem:[%s5016_s7 + $0x60] sm:$0xff]  ;;  %v1012_v38 = vld [vmem:[%s5016_s7 + $0x68] sm:$0xff]  ;;  %v3627_v5 = vpack.c.bf16 %v2591_v37, %v2590_v3 }
 0x485   :  { %3640 = vmatprep.subr.bf16.mxu1 %v3639_v7 }
 0x486   :  { %v932_v39 = vmax.f32 %v931_v22, 0.0  ;;  %v3595_v22 = vpack.c.bf16 %v1012_v38, %v1011_v36 }
 0x488   :  { %v933_v40 = vadd.f32 1e-05, %v932_v39  ;;  %3642 = vmatpush3.bf16.msra.mxu1 %v3639_v7  ;;  %v1013_v39 = vld [vmem:[%s5016_s7 + $0x70] sm:$0xff]  ;;  %v2593_v7 = vld [vmem:[%s5016_s7 + $0x178] sm:$0xff] }
 0x489   :  { %3644 = vmatprep.subr.bf16.mxu1 %v3643_v10  ;;  %v3631_v8 = vpack.c.bf16 %v2593_v7, %v2592_v6 }
 0x48a   :  { %3822 = vrsqrt.f32 %v933_v40  ;;  %v1014_v40 = vld [vmem:[%s5016_s7 + $0x78] sm:$0xff] }
 0x48c   :  { %3646 = vmatpush3.bf16.msra.mxu1 %v3643_v10 }
 0x494   :  { %v3823_v43 = vpop.eup %3822 }
 0x495   :  { %v935_v44 = vmul.f32 %v3823_v43, %v876_v41  ;;  %v3599_v41 = vpack.c.bf16 %v1014_v40, %v1013_v39  ;;  %v976_v43 = vand.u32 7, %v4183_v52  ;;  %v2580_v52 = vld [vmem:[%s5016_s7 + $0x110] sm:$0xff]  ;;  %v1310_v40 = vld [vmem:[%s5018_s9 + $0x38] sm:$0xff] }
 0x496   :  { %v1309_v39 = vld [vmem:[%s5018_s9 + $0x30] sm:$0xff] }
 0x497   :  { %v936_v46 = vmul.f32 %v935_v44, %v928_v34  ;;  %v941_v47 = vrot.slane %v935_v44, %v4423_v42  ;;  %v1010_v34 = vld [vmem:[%s5016_s7 + $0x58] sm:$0xff]  ;;  %v2578_v44 = vld [vmem:[%s5016_s7 + $0x100] sm:$0xff]  ;;  %vm4518_vm0 = vcmp.eq.s32.totalorder %v976_v43, 0  ;;  %vm4576_vm8 = vcmp.eq.s32.totalorder %v976_v43, 7 }
 0x498   :  { %v3591_v35 = vpack.c.bf16 %v1010_v34, %v1009_v31  ;;  %vm2576_vm5 = vmneg %vm4518_vm0  ;;  %v1308_v31 = vld [vmem:[%s5018_s9 + $0x28] sm:$0xff]  ;;  %v2611_v43 = vld [vmem:[%s5018_s9 + $0x80] sm:$0xff] }
 0x499   :  { %v937_v48 = vsub.f32 %v877_v45, %v936_v46  ;;  %v942_v49 = vmul.f32 %v941_v47, %v4347_v26  ;;  %v943_v50 = vmul.f32 %v941_v47, %v4345_v24  ;;  %v944_v51 = vmul.f32 %v941_v47, %v4357_v33  ;;  %v2579_v45 = vld [vmem:[%s5016_s7 + $0x108] sm:$0xff]  ;;  %vm2596_vm9 = vmneg %vm4576_vm8  ;;  %v2617_v46 = vld [vmem:[%s5018_s9 + $0xb0] sm:$0xff] }
 0x49a   :  { %v945_v53 = vmul.f32 %v941_v47, %v4355_v32  ;;  %v3603_v47 = vpack.c.bf16 %v2579_v45, %v2578_v44  ;;  %v3667_v44 = vpack.c.bf16 %v2612_v17, %v2611_v43  ;;  %v2613_v45 = vld [vmem:[%s5018_s9 + $0x90] sm:$0xff] }
 0x49b   :  { %v950_v54 = vrot.slane %v937_v48, %v4423_v42 }
 0x49d   :  { %v952_v57 = vadd.f32 %v950_v54, %v942_v49  ;;  %v953_v58 = vadd.f32 %v950_v54, %v943_v50  ;;  %v954_v60 = vadd.f32 %v950_v54, %v944_v51  ;;  %v955_v26 = vadd.f32 %v950_v54, %v945_v53  ;;  %v2581_v50 = vld [vmem:[%s5016_s7 + $0x118] sm:$0xff] }
 0x49e   :  { %v3607_v54 = vpack.c.bf16 %v2581_v50, %v2580_v52  ;;  %v2615_v50 = vld [vmem:[%s5018_s9 + $0xa0] sm:$0xff] }
 0x49f   :  { %956 = vst [vmem:[#allocation2] sm:$0xff] %v952_v57  ;;  %957 = vst [vmem:[#allocation2 + $0x8] sm:$0xff] %v953_v58  ;;  %v2583_v57 = vld [vmem:[%s5016_s7 + $0x128] sm:$0xff] }
 0x4a0   :  { %958 = vst [vmem:[#allocation2 + $0x10] sm:$0xff] %v954_v60  ;;  %959 = vst [vmem:[#allocation2 + $0x18] sm:$0xff] %v955_v26  ;;  %v3611_v60 = vpack.c.bf16 %v2583_v57, %v2582_v56  ;;  %v2584_v26 = vld [vmem:[%s5016_s7 + $0x130] sm:$0xff] }
 0x4a6   :  { %v960_v33 = vld [vmem:[#allocation2] ss:$2 sm:$0xff]  ;;  %v964_v0 = vld [vmem:[#allocation2 + $0x1] ss:$2 sm:$0xff] }
 0x4a7   :  { %v962_v24 = vld [vmem:[#allocation2 + $0x10] ss:$2 sm:$0xff]  ;;  %v966_v32 = vld [vmem:[#allocation2 + $0x11] ss:$2 sm:$0xff]  ;;  %v967_v1 = vmax.f32 %v960_v33, %v964_v0  ;;  %v2587_v33 = vld [vmem:[%s5016_s7 + $0x148] sm:$0xff] }
 0x4a8   :  { %v968_v62 = vmax.f32 %v962_v24, %v966_v32  ;;  %v2586_v32 = vld [vmem:[%s5016_s7 + $0x140] sm:$0xff]  ;;  %v2588_v0 = vld [vmem:[%s5016_s7 + $0x150] sm:$0xff] }
 0x4a9   :  { %969 = vrot.lane.b32.xlu0 %v967_v1, %s3859_s28 }
 0x4aa   :  { %971 = vrot.lane.b32.xlu1 %v968_v62, %s3859_s28 }
 0x51b   :  { %v970_v16 = vpop.permute.xlu0 %969 }
 0x51c   :  { %v972_v12 = vpop.permute.xlu1 %971  ;;  %v973_v18 = vmax.f32 %v967_v1, %v970_v16  ;;  %v2589_v1 = vld [vmem:[%s5016_s7 + $0x158] sm:$0xff] }
 0x51d   :  { %v4465_v15 = vmax.f32 %v968_v62, %v972_v12  ;;  %v3619_v62 = vpack.c.bf16 %v2587_v33, %v2586_v32  ;;  %v3623_v2 = vpack.c.bf16 %v2589_v1, %v2588_v0  ;;  %v2606_v12 = vld [vmem:[%s5018_s9 + $0x78] sm:$0xff] }
 0x51e   :  { %v981_v20 = vrot.slane %v973_v18, 7  ;;  %3102 = vmatprep.mubr.f32.mxu0 %v973_v18  ;;  %v991_v53 = vrot.slane %v973_v18, 1  ;;  %v3647_v13 = vpack.c.bf16 %v2606_v12, %v2605_v11  ;;  %v2598_v18 = vld [vmem:[%s5017_s8] ss:$0 sm:$0xff] }
 0x51f   :  { %3103 = vmatmul.mubr.f32.vlgmr.msra.gmra.mrb[4].mxu0 %v4465_v15  ;;  %v982_v48 = vrot.slane %v4465_v15, 7  ;;  %v992_v51 = vrot.slane %v4465_v15, 1  ;;  %v1304_v15 = vld [vmem:[%s5018_s9 + $0x8] sm:$0xff] }
 0x520   :  { %3574 = vmatpush3.bf16.msra.mxu0 %v3571_v61  ;;  %v986_v59 = vsel %vm153_vm4, 0.0, %v981_v20  ;;  %v2585_v61 = vld [vmem:[%s5016_s7 + $0x138] sm:$0xff]  ;;  %3648 = vmatprep.subr.bf16.mxu1 %v3647_v13  ;;  %v3651_v16 = vpack.c.bf16 %v1304_v15, %v1303_v14 }
 0x521   :  { %3137 = vmatprep.mubr.msk.f32.mxu0 %vm2574_vm15, %v986_v59  ;;  %3576 = vmatprep.subr.bf16.mxu0 %v3575_v19  ;;  %v983_v55 = vsel %vm153_vm4, %v981_v20, %v982_v48  ;;  %v993_v58 = vsel %vm174_vm7, %v991_v53, %v992_v51  ;;  %v3615_v24 = vpack.c.bf16 %v2585_v61, %v2584_v26  ;;  %v996_v10 = vsel %vm174_vm7, %v992_v51, 0.0  ;;  %v1305_v20 = vld [vmem:[%s5018_s9 + $0x10] sm:$0xff]  ;;  %v2616_v51 = vld [vmem:[%s5018_s9 + $0xa8] sm:$0xff] }
 0x522   :  { %3650 = vmatpush3.bf16.msra.mxu1 %v3647_v13 }
 0x523   :  { %3652 = vmatprep.subr.bf16.mxu1 %v3651_v16 }
 0x524   :  { %3578 = vmatpush3.bf16.msra.mxu0 %v3575_v19 }
 0x525   :  { %3580 = vmatprep.subr.bf16.mxu0 %v3579_v23 }
 0x528   :  { %3582 = vmatpush3.bf16.msra.mxu0 %v3579_v23 }
 0x529   :  { %3584 = vmatprep.subr.bf16.mxu0 %v3583_v28 }
 0x52c   :  { %3586 = vmatpush3.bf16.msra.mxu0 %v3583_v28  ;;  %v3655_v28 = vpack.c.bf16 %v1306_v4, %v1305_v20 }
 0x52d   :  { %3588 = vmatprep.subr.bf16.mxu0 %v3587_v30 }
 0x530   :  { %3590 = vmatpush3.bf16.msra.mxu0 %v3587_v30  ;;  %v1307_v30 = vld [vmem:[%s5018_s9 + $0x20] sm:$0xff] }
 0x531   :  { %3592 = vmatprep.subr.bf16.mxu0 %v3591_v35 }
 0x534   :  { %3594 = vmatpush3.bf16.msra.mxu0 %v3591_v35 }
 0x535   :  { %3596 = vmatprep.subr.bf16.mxu0 %v3595_v22 }
 0x538   :  { %3598 = vmatpush3.bf16.msra.mxu0 %v3595_v22  ;;  %v3659_v22 = vpack.c.bf16 %v1308_v31, %v1307_v30 }
 0x539   :  { %3600 = vmatprep.subr.bf16.mxu0 %v3599_v41 }
 0x53c   :  { %3602 = vmatpush3.bf16.msra.mxu0 %v3599_v41  ;;  %v3663_v41 = vpack.c.bf16 %v1310_v40, %v1309_v39 }
 0x53d   :  { %3604 = vmatprep.subr.bf16.mxu0 %v3603_v47 }
 0x53f   :  { %3138 = vmatmul.mubr.msk.f32.vlgmr.msra.gmra.mrb[4].mxu0 %vm2576_vm5, %v983_v55  ;;  %v2618_v55 = vld [vmem:[%s5018_s9 + $0xb8] sm:$0xff] }
 0x540   :  { %3606 = vmatpush3.bf16.msra.mxu0 %v3603_v47  ;;  %3172 = vmatprep.mubr.msk.f32.mxu0 %vm2594_vm6, %v993_v58  ;;  %v2614_v47 = vld [vmem:[%s5018_s9 + $0x98] sm:$0xff]  ;;  %v3679_v56 = vpack.c.bf16 %v2618_v55, %v2617_v46  ;;  %v2621_v58 = vld [vmem:[%s5019_s10] ss:$0 sm:$0xff]  ;;  %s3860_s9 = smov 72   ;;  %s3861_s10 = smov 80  }
 0x541   :  { %3608 = vmatprep.subr.bf16.mxu0 %v3607_v54  ;;  %v3671_v48 = vpack.c.bf16 %v2614_v47, %v2613_v45  ;;  %v1709_v55 = vld [vmem:[%s5022_s13 + $0x40] sm:$0xff] }
 0x544   :  { %3610 = vmatpush3.bf16.msra.mxu0 %v3607_v54  ;;  %v3675_v54 = vpack.c.bf16 %v2616_v51, %v2615_v50 }
 0x545   :  { %3612 = vmatprep.subr.bf16.mxu0 %v3611_v60 }
 0x548   :  { %3614 = vmatpush3.bf16.msra.mxu0 %v3611_v60 }
 0x549   :  { %3616 = vmatprep.subr.bf16.mxu0 %v3615_v24 }
 0x54c   :  { %3618 = vmatpush3.bf16.msra.mxu0 %v3615_v24 }
 0x54d   :  { %3620 = vmatprep.subr.bf16.mxu0 %v3619_v62 }
 0x550   :  { %3622 = vmatpush3.bf16.msra.mxu0 %v3619_v62 }
 0x551   :  { %3624 = vmatprep.subr.bf16.mxu0 %v3623_v2 }
 0x554   :  { %3626 = vmatpush3.bf16.msra.mxu0 %v3623_v2 }
 0x555   :  { %3628 = vmatprep.subr.bf16.mxu0 %v3627_v5 }
 0x558   :  { %3630 = vmatpush3.bf16.msra.mxu0 %v3627_v5 }
 0x559   :  { %3632 = vmatprep.subr.bf16.mxu0 %v3631_v8 }
 0x55c   :  { %3634 = vmatpush3.bf16.msra.mxu0 %v3631_v8 }
 0x55f   :  { %3173 = vmatmul.mubr.msk.f32.vlgmr.msra.gmra.mrb[4].mxu0 %vm2596_vm9, %v996_v10 }
 0x632   :  { %v3174_v19 = vpop.f32.mrb[4].mxu0 }
 0x633   :  { %v1284_v21 = vadd.f32 %v3174_v19, %v2598_v18  ;;  %v1265_v59 = vpop.f32.mrb[5].mxu0 }
 0x634   :  { %v1283_v23 = vadd.f32 %v2598_v18, %v1265_v59 }
 0x635   :  { %v1288_v27 = vrot.slane %v1284_v21, 7  ;;  %v1296_v63 = vrot.slane %v1284_v21, 1 }
 0x636   :  { %v1287_v25 = vrot.slane %v1283_v23, 7  ;;  %v1295_v29 = vrot.slane %v1283_v23, 1  ;;  %3191 = vmatprep.mubr.msk.f32.mxu1 %vm208_vm3, %v1283_v23 }
 0x637   :  { %3192 = vmatmul.mubr.msk.f32.vlgmr.msra.gmra.mrb[4].mxu1 %vm208_vm3, %v1284_v21  ;;  %v1300_v49 = vsel %vm174_vm7, %v1296_v63, 0.0 }
 0x638   :  { %3654 = vmatpush3.bf16.msra.mxu1 %v3651_v16  ;;  %v1292_v34 = vsel %vm153_vm4, 0.0, %v1287_v25  ;;  %v1289_v35 = vsel %vm153_vm4, %v1287_v25, %v1288_v27  ;;  %v1297_v36 = vsel %vm174_vm7, %v1295_v29, %v1296_v63  ;;  %v1302_v57 = vsel %vm4576_vm8, 0.0, %v1300_v49  ;;  %v1699_v49 = vld [vmem:[%s5022_s13] sm:$0xff] }
 0x639   :  { %3656 = vmatprep.subr.bf16.mxu1 %v3655_v28  ;;  %v1293_v38 = vsel %vm4467_vm14, 0.0, %v1292_v34  ;;  %v1294_v52 = vsel %vm4518_vm0, 0.0, %v1289_v35  ;;  %v1301_v53 = vsel %vm4523_vm2, 0.0, %v1297_v36  ;;  %vm1594_vm4 = vcmask 1048064  }
 0x63a   :  { %3210 = vmatprep.mubr.msk.f32.mxu1 %vm208_vm3, %v1293_v38  ;;  %vm3864_vm7 = vmmov 0  }
 0x63c   :  { %3658 = vmatpush3.bf16.msra.mxu1 %v3655_v28 }
 0x63d   :  { %3660 = vmatprep.subr.bf16.mxu1 %v3659_v22 }
 0x640   :  { %3662 = vmatpush3.bf16.msra.mxu1 %v3659_v22 }
 0x641   :  { %3664 = vmatprep.subr.bf16.mxu1 %v3663_v41 }
 0x644   :  { %3666 = vmatpush3.bf16.msra.mxu1 %v3663_v41 }
 0x645   :  { %3668 = vmatprep.subr.bf16.mxu1 %v3667_v44 }
 0x647   :  { %3211 = vmatmul.mubr.msk.f32.vlgmr.msra.gmra.mrb[4].mxu1 %vm208_vm3, %v1294_v52 }
 0x648   :  { %3670 = vmatpush3.bf16.msra.mxu1 %v3667_v44  ;;  %3229 = vmatprep.mubr.msk.f32.mxu1 %vm208_vm3, %v1301_v53 }
 0x649   :  { %3672 = vmatprep.subr.bf16.mxu1 %v3671_v48 }
 0x64c   :  { %3674 = vmatpush3.bf16.msra.mxu1 %v3671_v48 }
 0x64d   :  { %3676 = vmatprep.subr.bf16.mxu1 %v3675_v54 }
 0x650   :  { %3678 = vmatpush3.bf16.msra.mxu1 %v3675_v54 }
 0x651   :  { %3680 = vmatprep.subr.bf16.mxu1 %v3679_v56 }
 0x654   :  { %3682 = vmatpush3.bf16.msra.mxu1 %v3679_v56  ;;  %v1710_v56 = vld [vmem:[%s5022_s13 + $0x48] sm:$0xff] }
 0x657   :  { %3230 = vmatmul.mubr.msk.f32.vlgmr.msra.gmra.mrb[4].mxu1 %vm208_vm3, %v1302_v57  ;;  %v3684_v57 = vpack.c.bf16 %v1710_v56, %v1709_v55  ;;  %v1953_v55 = vld [vmem:[%s5022_s13 + $0xe0] sm:$0xff]  ;;  %v1954_v56 = vld [vmem:[%s5022_s13 + $0xe8] sm:$0xff] }
 0x72a   :  { %v3231_v60 = vpop.f32.mrb[4].mxu1 }
 0x72b   :  { %v1580_v26 = vadd.f32 %v3231_v60, %v2621_v58  ;;  %v1561_v61 = vpop.f32.mrb[5].mxu1  ;;  %v3863_v60 = vmov 0.0|0.0  }
 0x72c   :  { %v1579_v24 = vadd.f32 %v2621_v58, %v1561_v61  ;;  %v1700_v58 = vld [vmem:[%s5022_s13 + $0x8] sm:$0xff]  ;;  %3683 = vmatprep.subr.bf16.mxu0 %v3863_v60  ;;  %3695 = vmatprep.subr.bf16.mxu1 %v3863_v60  ;;  %v1711_v61 = vld [vmem:[%s5022_s13 + $0x50] sm:$0xff] }
 0x72d   :  { %v4661_v32 = vmax.f32 %v1580_v26, 0.0  ;;  %v3696_v26 = vpack.c.bf16 %v1700_v58, %v1699_v49  ;;  %3685 = vmatpush3.bf16.msra.mxu0 %v3684_v57  ;;  %v3726_v57 = vpack.c.bf16 %v1954_v56, %v1953_v55  ;;  %v1871_v58 = vld [vmem:[%s5022_s13 + $0xb0] sm:$0xff] }
 0x72e   :  { %v4663_v33 = vmax.f32 %v1579_v24, 0.0  ;;  %3686 = vmatprep.subr.bf16.mxu0 %v3863_v60  ;;  %v1712_v24 = vld [vmem:[%s5022_s13 + $0x58] sm:$0xff] }
 0x72f   :  { %v1586_v62 = vsel %vm208_vm3, %v4661_v32, 0.0  ;;  %v1629_v0 = vmul.f32 %v4661_v32, %v4661_v32  ;;  %3697 = vmatpush3.bf16.msra.mxu1 %v3696_v26  ;;  %v1872_v26 = vld [vmem:[%s5022_s13 + $0xb8] sm:$0xff] }
 0x730   :  { %v1585_v1 = vsel %vm208_vm3, %v4663_v33, 0.0  ;;  %v1628_v2 = vmul.f32 %v4663_v33, %v4663_v33  ;;  %3698 = vmatprep.subr.bf16.mxu1 %v3863_v60 }
 0x731   :  { %v1631_v3 = vsel %vm208_vm3, %v1629_v0, 0.0  ;;  %v1587_v37 = vadd.f32 %v1586_v62, %v1585_v1  ;;  %v1701_v62 = vld [vmem:[%s5022_s13 + $0x10] sm:$0xff]  ;;  %v3687_v0 = vpack.c.bf16 %v1712_v24, %v1711_v61  ;;  %v1702_v1 = vld [vmem:[%s5022_s13 + $0x18] sm:$0xff] }
 0x732   :  { %v1630_v5 = vsel %vm208_vm3, %v1628_v2, 0.0  ;;  %v3699_v2 = vpack.c.bf16 %v1702_v1, %v1701_v62  ;;  %v1955_v61 = vld [vmem:[%s5022_s13 + $0xf0] sm:$0xff]  ;;  %v1956_v24 = vld [vmem:[%s5022_s13 + $0xf8] sm:$0xff]  ;;  %v3717_v62 = vpack.c.bf16 %v1872_v26, %v1871_v58  ;;  %v2033_v1 = vld [vmem:[%s5022_s13 + $0x100] sm:$0xff] }
 0x733   :  { %v1588_v6 = vrot.slane %v1587_v37, 4  ;;  %v1632_v7 = vadd.f32 %v1631_v3, %v1630_v5  ;;  %3688 = vmatpush3.bf16.msra.mxu0 %v3687_v0  ;;  %v1713_v3 = vld [vmem:[%s5022_s13 + $0x60] sm:$0xff]  ;;  %v3729_v0 = vpack.c.bf16 %v1956_v24, %v1955_v61  ;;  %v2378_v26 = vld [vmem:[%s5024_s15 + $0x10] sm:$0xff] }
 0x734   :  { %3700 = vmatpush3.bf16.msra.mxu1 %v3699_v2  ;;  %3689 = vmatprep.subr.bf16.mxu0 %v3863_v60  ;;  %v1703_v5 = vld [vmem:[%s5022_s13 + $0x20] sm:$0xff]  ;;  %v2034_v2 = vld [vmem:[%s5022_s13 + $0x108] sm:$0xff] }
 0x735   :  { %v1589_v8 = vadd.f32 %v1588_v6, %v1587_v37  ;;  %v1633_v9 = vrot.slane %v1632_v7, 4  ;;  %v1714_v37 = vld [vmem:[%s5022_s13 + $0x68] sm:$0xff]  ;;  %3701 = vmatprep.subr.bf16.mxu1 %v3863_v60 }
 0x736   :  { %v3690_v6 = vpack.c.bf16 %v1714_v37, %v1713_v3  ;;  %v2117_v3 = vld [vmem:[%s5022_s13 + $0x140] sm:$0xff]  ;;  %v2118_v37 = vld [vmem:[%s5022_s13 + $0x148] sm:$0xff] }
 0x737   :  { %v1590_v10 = vrot.slane %v1589_v8, 2  ;;  %v1634_v11 = vadd.f32 %v1633_v9, %v1632_v7  ;;  %v1704_v7 = vld [vmem:[%s5022_s13 + $0x28] sm:$0xff]  ;;  %v1715_v9 = vld [vmem:[%s5022_s13 + $0x70] sm:$0xff] }
 0x738   :  { %3691 = vmatpush3.bf16.msra.mxu0 %v3690_v6  ;;  %v3744_v6 = vpack.c.bf16 %v2118_v37, %v2117_v3 }
 0x739   :  { %v1591_v12 = vadd.f32 %v1590_v10, %v1589_v8  ;;  %v1635_v13 = vrot.slane %v1634_v11, 2  ;;  %v3702_v8 = vpack.c.bf16 %v1704_v7, %v1703_v5  ;;  %v1716_v10 = vld [vmem:[%s5022_s13 + $0x78] sm:$0xff]  ;;  %3692 = vmatprep.subr.bf16.mxu0 %v3863_v60  ;;  %v3732_v5 = vpack.c.bf16 %v2034_v2, %v2033_v1  ;;  %v2035_v7 = vld [vmem:[%s5022_s13 + $0x110] sm:$0xff] }
 0x73b   :  { %v1592_v14 = vrot.slane %v1591_v12, 1  ;;  %v1636_v15 = vadd.f32 %v1635_v13, %v1634_v11  ;;  %v1705_v11 = vld [vmem:[%s5022_s13 + $0x30] sm:$0xff]  ;;  %3703 = vmatpush3.bf16.msra.mxu1 %v3702_v8  ;;  %v1706_v13 = vld [vmem:[%s5022_s13 + $0x38] sm:$0xff] }
 0x73c   :  { %3704 = vmatprep.subr.bf16.mxu1 %v3863_v60  ;;  %v2036_v8 = vld [vmem:[%s5022_s13 + $0x118] sm:$0xff] }
 0x73d   :  { %v1593_v16 = vadd.f32 %v1592_v14, %v1591_v12  ;;  %v1637_v18 = vrot.slane %v1636_v15, 1  ;;  %v3693_v12 = vpack.c.bf16 %v1716_v10, %v1715_v9  ;;  %v3705_v14 = vpack.c.bf16 %v1706_v13, %v1705_v11  ;;  %v2119_v9 = vld [vmem:[%s5022_s13 + $0x150] sm:$0xff]  ;;  %v2120_v10 = vld [vmem:[%s5022_s13 + $0x158] sm:$0xff] }
 0x73e   :  { %v3735_v13 = vpack.c.bf16 %v2036_v8, %v2035_v7 }
 0x73f   :  { %1595 = vrot.lane.b32.xlu0 %v1593_v16, %s3858_s26  ;;  %v1638_v19 = vadd.f32 %v1637_v18, %v1636_v15  ;;  %v3865_v15 = vmov 0.0   ;;  %3694 = vmatpush3.bf16.msra.mxu0 %v3693_v12 }
 0x740   :  { %3248 = vmatprep.mubr.msk.f32.mxu0 %vm3864_vm7, %v3865_v15  ;;  %3267 = vmatprep.mubr.msk.f32.mxu1 %vm3864_vm7, %v3865_v15 }
 0x741   :  { %1639 = vrot.lane.b32.xlu1 %v1638_v19, %s3858_s26  ;;  %3706 = vmatpush3.bf16.msra.mxu1 %v3705_v14  ;;  %v3747_v14 = vpack.c.bf16 %v2120_v10, %v2119_v9 }
 0x742   :  { %3707 = vmatprep.subr.bf16.mxu0 %v3863_v60  ;;  %3719 = vmatprep.subr.bf16.mxu1 %v3863_v60 }
 0x7b1   :  { %v1596_v20 = vpop.permute.xlu0 %1595 }
 0x7b2   :  { %v1597_v4 = vsel %vm1594_vm4, %v1596_v20, %v1593_v16 }
 0x7b3   :  { %v1640_v21 = vpop.permute.xlu1 %1639  ;;  %1598 = vrot.lane.b32.xlu0 %v1597_v4, %s3858_s26 }
 0x7b4   :  { %v1641_v59 = vsel %vm1594_vm4, %v1640_v21, %v1638_v19 }
 0x7b5   :  { %1642 = vrot.lane.b32.xlu1 %v1641_v59, %s3858_s26 }
 0x825   :  { %v1599_v23 = vpop.permute.xlu0 %1598 }
 0x826   :  { %v1600_v27 = vsel %vm1594_vm4, %v1599_v23, %v1593_v16 }
 0x827   :  { %v1643_v63 = vpop.permute.xlu1 %1642  ;;  %1602 = vrot.lane.b32.xlu0 %v1600_v27, %s3860_s9 }
 0x828   :  { %v1644_v28 = vsel %vm1594_vm4, %v1643_v63, %v1638_v19 }
 0x829   :  { %1646 = vrot.lane.b32.xlu1 %v1644_v28, %s3860_s9  ;;  %v1581_v28 = vld [vmem:[%s5020_s11] sm:$0x1] }
 0x899   :  { %v1603_v25 = vpop.permute.xlu0 %1602 }
 0x89a   :  { %v1605_v29 = vadd.f32 %v1603_v25, %v1593_v16 }
 0x89b   :  { %v1647_v30 = vpop.permute.xlu1 %1646 }
 0x89c   :  { %v1649_v31 = vadd.f32 %v1647_v30, %v1638_v19  ;;  %1606 = vrot.lane.b32.xlu0 %v1605_v29, %s3858_s26  ;;  %v1582_v30 = vld [vmem:[%s5021_s12] sm:$0x1] }
 0x89e   :  { %1650 = vrot.lane.b32.xlu1 %v1649_v31, %s3858_s26 }
 0x90e   :  { %v1607_v34 = vpop.permute.xlu0 %1606 }
 0x90f   :  { %v1608_v35 = vsel %vm1594_vm4, %v1607_v34, %v1605_v29 }
 0x910   :  { %v1651_v36 = vpop.permute.xlu1 %1650  ;;  %1609 = vrot.lane.b32.xlu0 %v1608_v35, %s3858_s26 }
 0x911   :  { %v1652_v38 = vsel %vm1594_vm4, %v1651_v36, %v1649_v31 }
 0x912   :  { %1653 = vrot.lane.b32.xlu1 %v1652_v38, %s3858_s26 }
 0x982   :  { %v1610_v22 = vpop.permute.xlu0 %1609 }
 0x983   :  { %v1611_v39 = vsel %vm1594_vm4, %v1610_v22, %v1605_v29 }
 0x984   :  { %v1654_v40 = vpop.permute.xlu1 %1653  ;;  %1613 = vrot.lane.b32.xlu0 %v1611_v39, %s3861_s10 }
 0x985   :  { %v1655_v41 = vsel %vm1594_vm4, %v1654_v40, %v1649_v31 }
 0x986   :  { %1657 = vrot.lane.b32.xlu1 %v1655_v41, %s3861_s10  ;;  %v1865_v41 = vld [vmem:[%s5022_s13 + $0x80] sm:$0xff] }
 0x9f6   :  { %v1614_v43 = vpop.permute.xlu0 %1613 }
 0x9f7   :  { %v4691_v17 = vadd.f32 %v1614_v43, %v1605_v29  ;;  %v1866_v43 = vld [vmem:[%s5022_s13 + $0x88] sm:$0xff] }
 0x9f8   :  { %v1658_v44 = vpop.permute.xlu1 %1657 }
 0x9f9   :  { %v4693_v45 = vadd.f32 %v1658_v44, %v1649_v31  ;;  %1617 = vrot.lane.b32.xlu0 %v4691_v17, %s3858_s26  ;;  %v1867_v44 = vld [vmem:[%s5022_s13 + $0x90] sm:$0xff] }
 0x9fb   :  { %1661 = vrot.lane.b32.xlu1 %v4693_v45, %s3858_s26 }
 0xa6b   :  { %v1618_v47 = vpop.permute.xlu0 %1617 }
 0xa6c   :  { %v1619_v48 = vsel %vm1594_vm4, %v1618_v47, %v4691_v17  ;;  %v1951_v47 = vld [vmem:[%s5022_s13 + $0xd0] sm:$0xff] }
 0xa6d   :  { %v1662_v52 = vpop.permute.xlu1 %1661  ;;  %1620 = vrot.lane.b32.xlu0 %v1619_v48, %s3858_s26  ;;  %v1952_v48 = vld [vmem:[%s5022_s13 + $0xd8] sm:$0xff] }
 0xa6e   :  { %v1663_v50 = vsel %vm1594_vm4, %v1662_v52, %v4693_v45 }
 0xa6f   :  { %1664 = vrot.lane.b32.xlu1 %v1663_v50, %s3858_s26 }
 0xadf   :  { %v1621_v51 = vpop.permute.xlu0 %1620 }
 0xae0   :  { %v1622_v53 = vsel %vm1594_vm4, %v1621_v51, %v4691_v17 }
 0xae1   :  { %v1665_v54 = vpop.permute.xlu1 %1664  ;;  %1624 = vrot.lane.b32.xlu0 %v1622_v53, %s3862_s24  ;;  %v3723_v53 = vpack.c.bf16 %v1952_v48, %v1951_v47 }
 0xae2   :  { %v1666_v46 = vsel %vm1594_vm4, %v1665_v54, %v4693_v45  ;;  %v1869_v54 = vld [vmem:[%s5022_s13 + $0xa0] sm:$0xff] }
 0xae3   :  { %1668 = vrot.lane.b32.xlu1 %v1666_v46, %s3862_s24  ;;  %v1870_v46 = vld [vmem:[%s5022_s13 + $0xa8] sm:$0xff] }
 0xae4   :  { %v3714_v49 = vpack.c.bf16 %v1870_v46, %v1869_v54 }
 0xb53   :  { %v1625_v16 = vpop.permute.xlu0 %1624 }
 0xb54   :  { %v1627_v18 = vadd.f32 %v1625_v16, %v4691_v17  ;;  %v2037_v16 = vld [vmem:[%s5022_s13 + $0x120] sm:$0xff] }
 0xb55   :  { %v1669_v19 = vpop.permute.xlu1 %1668 }
 0xb56   :  { %v1672_v20 = vmul.f32 0.0078125, %v1627_v18  ;;  %v1671_v4 = vadd.f32 %v1669_v19, %v4693_v45  ;;  %v1868_v45 = vld [vmem:[%s5022_s13 + $0x98] sm:$0xff]  ;;  %v2038_v18 = vld [vmem:[%s5022_s13 + $0x128] sm:$0xff]  ;;  %v2121_v19 = vld [vmem:[%s5022_s13 + $0x160] sm:$0xff] }
 0xb57   :  { %v3711_v51 = vpack.c.bf16 %v1868_v45, %v1867_v44  ;;  %v2289_v44 = vld [vmem:[%s5022_s13 + $0x1e0] sm:$0xff]  ;;  %v2290_v45 = vld [vmem:[%s5022_s13 + $0x1e8] sm:$0xff] }
 0xb58   :  { %v1674_v21 = vmul.f32 %v1672_v20, %v1672_v20  ;;  %v1673_v59 = vmul.f32 0.0078125, %v1671_v4  ;;  %v3738_v4 = vpack.c.bf16 %v2038_v18, %v2037_v16  ;;  %v3774_v48 = vpack.c.bf16 %v2290_v45, %v2289_v44 }
 0xb5a   :  { %v1675_v23 = vsub.f32 %v1673_v59, %v1674_v21  ;;  %v2039_v59 = vld [vmem:[%s5022_s13 + $0x130] sm:$0xff] }
 0xb5c   :  { %v1676_v27 = vmax.f32 %v1675_v23, 0.0  ;;  %v2040_v23 = vld [vmem:[%s5022_s13 + $0x138] sm:$0xff] }
 0xb5e   :  { %v1677_v63 = vadd.f32 1e-05, %v1676_v27  ;;  %v2123_v27 = vld [vmem:[%s5022_s13 + $0x170] sm:$0xff] }
 0xb60   :  { %3824 = vrsqrt.f32 %v1677_v63  ;;  %v2124_v63 = vld [vmem:[%s5022_s13 + $0x178] sm:$0xff] }
 0xb6a   :  { %v3825_v25 = vpop.eup %3824 }
 0xb6b   :  { %v1679_v29 = vmul.f32 %v3825_v25, %v1581_v28  ;;  %v3741_v28 = vpack.c.bf16 %v2040_v23, %v2039_v59  ;;  %v3753_v25 = vpack.c.bf16 %v2124_v63, %v2123_v27  ;;  %v2631_v27 = vld [vmem:[%s5025_s16] ss:$0 sm:$0xff] }
 0xb6d   :  { %v1680_v31 = vmul.f32 %v1679_v29, %v1672_v20  ;;  %v1685_v34 = vrot.slane %v1679_v29, %v4423_v42  ;;  %v2122_v20 = vld [vmem:[%s5022_s13 + $0x168] sm:$0xff]  ;;  %v2201_v29 = vld [vmem:[%s5022_s13 + $0x180] sm:$0xff] }
 0xb6e   :  { %v3750_v21 = vpack.c.bf16 %v2122_v20, %v2121_v19 }
 0xb6f   :  { %v1681_v35 = vsub.f32 %v1582_v30, %v1680_v31  ;;  %v1686_v36 = vmul.f32 %v1685_v34, %v4663_v33  ;;  %v1687_v38 = vmul.f32 %v1685_v34, %v4661_v32  ;;  %v1949_v32 = vld [vmem:[%s5022_s13 + $0xc0] sm:$0xff]  ;;  %v3708_v33 = vpack.c.bf16 %v1866_v43, %v1865_v41  ;;  %v2202_v30 = vld [vmem:[%s5022_s13 + $0x188] sm:$0xff] }
 0xb70   :  { %v2285_v31 = vld [vmem:[%s5022_s13 + $0x1c0] sm:$0xff]  ;;  %v2286_v34 = vld [vmem:[%s5022_s13 + $0x1c8] sm:$0xff] }
 0xb71   :  { %v1692_v22 = vrot.slane %v1681_v35, %v4423_v42  ;;  %v1950_v42 = vld [vmem:[%s5022_s13 + $0xc8] sm:$0xff]  ;;  %v3756_v35 = vpack.c.bf16 %v2202_v30, %v2201_v29 }
 0xb72   :  { %v3720_v17 = vpack.c.bf16 %v1950_v42, %v1949_v32 }
 0xb73   :  { %v1694_v39 = vadd.f32 %v1692_v22, %v1686_v36  ;;  %v1695_v40 = vadd.f32 %v1692_v22, %v1687_v38  ;;  %v3768_v36 = vpack.c.bf16 %v2286_v34, %v2285_v31  ;;  %v2203_v38 = vld [vmem:[%s5022_s13 + $0x190] sm:$0xff]  ;;  %v2204_v22 = vld [vmem:[%s5022_s13 + $0x198] sm:$0xff] }
 0xb74   :  { %v3759_v32 = vpack.c.bf16 %v2204_v22, %v2203_v38 }
 0xb75   :  { %1696 = vst.msk [vmem:[#allocation3] sm:$0xff] %vm208_vm3, %v1694_v39  ;;  %1697 = vst.msk [vmem:[#allocation3 + $0x8] sm:$0xff] %vm208_vm3, %v1695_v40  ;;  %v2287_v39 = vld [vmem:[%s5022_s13 + $0x1d0] sm:$0xff]  ;;  %v2288_v40 = vld [vmem:[%s5022_s13 + $0x1d8] sm:$0xff] }
 0xb76   :  { %v3771_v42 = vpack.c.bf16 %v2288_v40, %v2287_v39 }
 0xb7c   :  { %v1708_v52 = vld [vmem:[#allocation3 + $0x1] ss:$8 sm:$0x3]  ;;  %v1698_v50 = vld [vmem:[#allocation3] ss:$8 sm:$0x3] }
 0xb7d   :  { %3249 = vmatmul.mubr.msk.f32.vlgmr.msra.gmra.mrb[6].mxu0 %vm208_vm3, %v1708_v52  ;;  %3268 = vmatmul.mubr.msk.f32.vlgmr.msra.gmra.mrb[6].mxu1 %vm208_vm3, %v1698_v50  ;;  %v1864_v11 = vld [vmem:[#allocation3 + $0x2] ss:$8 sm:$0x3]  ;;  %v1948_v12 = vld [vmem:[#allocation3 + $0x3] ss:$8 sm:$0x3] }
 0xb7e   :  { %3709 = vmatpush3.bf16.msra.mxu0 %v3708_v33  ;;  %3721 = vmatpush3.bf16.msra.mxu1 %v3720_v17  ;;  %v2032_v41 = vld [vmem:[#allocation3 + $0x4] ss:$8 sm:$0x3]  ;;  %v2116_v43 = vld [vmem:[#allocation3 + $0x5] ss:$8 sm:$0x3] }
 0xb7f   :  { %3710 = vmatprep.subr.bf16.mxu0 %v3863_v60  ;;  %3722 = vmatprep.subr.bf16.mxu1 %v3863_v60  ;;  %v2205_v33 = vld [vmem:[%s5022_s13 + $0x1a0] sm:$0xff]  ;;  %v2206_v17 = vld [vmem:[%s5022_s13 + $0x1a8] sm:$0xff]  ;;  %v2207_v52 = vld [vmem:[%s5022_s13 + $0x1b0] sm:$0xff] }
 0xb80   :  { %3286 = vmatprep.mubr.msk.f32.mxu0 %vm3864_vm7, %v3865_v15  ;;  %3305 = vmatprep.mubr.msk.f32.mxu1 %vm3864_vm7, %v3865_v15  ;;  %v3762_v47 = vpack.c.bf16 %v2206_v17, %v2205_v33  ;;  %v2208_v50 = vld [vmem:[%s5022_s13 + $0x1b8] sm:$0xff]  ;;  %v2200_v55 = vld [vmem:[#allocation3 + $0x6] ss:$8 sm:$0x3] }
 0xb81   :  { %v3765_v54 = vpack.c.bf16 %v2208_v50, %v2207_v52  ;;  %v2284_v56 = vld [vmem:[#allocation3 + $0x7] ss:$8 sm:$0x3] }
 0xb82   :  { %3712 = vmatpush3.bf16.msra.mxu0 %v3711_v51  ;;  %3724 = vmatpush3.bf16.msra.mxu1 %v3723_v53  ;;  %v2291_v51 = vld [vmem:[%s5022_s13 + $0x1f0] sm:$0xff]  ;;  %v2292_v53 = vld [vmem:[%s5022_s13 + $0x1f8] sm:$0xff] }
 0xb83   :  { %3713 = vmatprep.subr.bf16.mxu0 %v3863_v60  ;;  %3725 = vmatprep.subr.bf16.mxu1 %v3863_v60  ;;  %v3777_v46 = vpack.c.bf16 %v2292_v53, %v2291_v51 }
 0xb86   :  { %3715 = vmatpush3.bf16.msra.mxu0 %v3714_v49  ;;  %3727 = vmatpush3.bf16.msra.mxu1 %v3726_v57  ;;  %v2376_v49 = vld [vmem:[%s5024_s15] sm:$0xff]  ;;  %v2377_v57 = vld [vmem:[%s5024_s15 + $0x8] sm:$0xff] }
 0xb87   :  { %3716 = vmatprep.subr.bf16.mxu0 %v3863_v60  ;;  %3728 = vmatprep.subr.bf16.mxu1 %v3863_v60  ;;  %v3780_v58 = vpack.c.bf16 %v2377_v57, %v2376_v49 }
 0xb8a   :  { %3718 = vmatpush3.bf16.msra.mxu0 %v3717_v62  ;;  %3730 = vmatpush3.bf16.msra.mxu1 %v3729_v0 }
 0xb8b   :  { %3731 = vmatprep.subr.bf16.mxu0 %v3863_v60  ;;  %3743 = vmatprep.subr.bf16.mxu1 %v3863_v60 }
 0xb8d   :  { %3287 = vmatmul.mubr.msk.f32.vlgmr.msra.gmra.mrb[8].mxu0 %vm208_vm3, %v1864_v11  ;;  %3306 = vmatmul.mubr.msk.f32.vlgmr.msra.gmra.mrb[8].mxu1 %vm208_vm3, %v1948_v12 }
 0xb8e   :  { %3733 = vmatpush3.bf16.msra.mxu0 %v3732_v5  ;;  %3745 = vmatpush3.bf16.msra.mxu1 %v3744_v6 }
 0xb8f   :  { %3734 = vmatprep.subr.bf16.mxu0 %v3863_v60  ;;  %3746 = vmatprep.subr.bf16.mxu1 %v3863_v60 }
 0xb90   :  { %3324 = vmatprep.mubr.msk.f32.mxu0 %vm3864_vm7, %v3865_v15  ;;  %3343 = vmatprep.mubr.msk.f32.mxu1 %vm3864_vm7, %v3865_v15 }
 0xb92   :  { %3736 = vmatpush3.bf16.msra.mxu0 %v3735_v13  ;;  %3748 = vmatpush3.bf16.msra.mxu1 %v3747_v14 }
 0xb93   :  { %3737 = vmatprep.subr.bf16.mxu0 %v3863_v60  ;;  %3749 = vmatprep.subr.bf16.mxu1 %v3863_v60 }
 0xb96   :  { %3739 = vmatpush3.bf16.msra.mxu0 %v3738_v4  ;;  %3751 = vmatpush3.bf16.msra.mxu1 %v3750_v21  ;;  %v2630_v4 = vld [vmem:[%s5023_s14] ss:$0 sm:$0xff]  ;;  %s3866_s14 = smov [#allocation4]  }
 0xb97   :  { %3740 = vmatprep.subr.bf16.mxu0 %v3863_v60  ;;  %3752 = vmatprep.subr.bf16.mxu1 %v3863_v60  ;;  %s2480_s16 = sshll.u32 %s3866_s14, 4  ;;  %s2481_s16 = int_to_ptr.vmem [resolvable:$true] %s2480_s16 }
 0xb98   :  { %s3830_s12 = scalar_lea.vmem %s2481_s16, 32  ;;  %p3835_p1 = scmp.lt.s32.totalorder %s2481_s16, %s2481_s16 }
 0xb99   :  { %p3831_p0 = scmp.ne.s32.totalorder %s2481_s16, %s3830_s12  ;;  %p3836_p2 = scmp.lt.s32.totalorder %s3830_s12, %s3830_s12 }
 0xb9a   :  { %3742 = vmatpush3.bf16.msra.mxu0 %v3741_v28  ;;  %3754 = vmatpush3.bf16.msra.mxu1 %v3753_v25 }
 0xb9b   :  { %3755 = vmatprep.subr.bf16.mxu0 %v3863_v60  ;;  %3767 = vmatprep.subr.bf16.mxu1 %v3863_v60  ;;  %p3837_p3 = por %p3836_p2, %p3835_p1 }
 0xb9d   :  { %3325 = vmatmul.mubr.msk.f32.vlgmr.msra.gmra.mrb[10].mxu0 %vm208_vm3, %v2032_v41  ;;  %3344 = vmatmul.mubr.msk.f32.vlgmr.msra.gmra.mrb[10].mxu1 %vm208_vm3, %v2116_v43  ;;  %p3838_p4 = pnand %p3837_p3, %p3831_p0 }
 0xb9e   :  { %3757 = vmatpush3.bf16.msra.mxu0 %v3756_v35  ;;  %3769 = vmatpush3.bf16.msra.mxu1 %v3768_v36 }
 0xb9f   :  { %3758 = vmatprep.subr.bf16.mxu0 %v3863_v60  ;;  %3770 = vmatprep.subr.bf16.mxu1 %v3863_v60 }
 0xba0   :  { %3362 = vmatprep.mubr.msk.f32.mxu0 %vm3864_vm7, %v3865_v15  ;;  %3381 = vmatprep.mubr.msk.f32.mxu1 %vm3864_vm7, %v3865_v15 }
 0xba2   :  { %3760 = vmatpush3.bf16.msra.mxu0 %v3759_v32  ;;  %3772 = vmatpush3.bf16.msra.mxu1 %v3771_v42 }
 0xba3   :  { %3761 = vmatprep.subr.bf16.mxu0 %v3863_v60  ;;  %3773 = vmatprep.subr.bf16.mxu1 %v3863_v60 }
 0xba6   :  { %3763 = vmatpush3.bf16.msra.mxu0 %v3762_v47  ;;  %3775 = vmatpush3.bf16.msra.mxu1 %v3774_v48 }
 0xba7   :  { %3764 = vmatprep.subr.bf16.mxu0 %v3863_v60  ;;  %3776 = vmatprep.subr.bf16.mxu1 %v3863_v60 }
 0xbaa   :  { %3766 = vmatpush3.bf16.msra.mxu0 %v3765_v54  ;;  %3778 = vmatpush3.bf16.msra.mxu1 %v3777_v46 }
 0xbab   :  { %3779 = vmatprep.subr.bf16.mxu0 %v3863_v60 }
 0xbad   :  { %3363 = vmatmul.mubr.msk.f32.vlgmr.msra.gmra.mrb[12].mxu0 %vm208_vm3, %v2200_v55  ;;  %3382 = vmatmul.mubr.msk.f32.vlgmr.msra.gmra.mrb[12].mxu1 %vm208_vm3, %v2284_v56  ;;  %vm2460_vm3 = vcmask 74752  }
 0xbae   :  { %3392 = vmatprep.mubr.msk.f32.mxu0 %vm3864_vm7, %v3865_v15  ;;  %3781 = vmatpush3.bf16.msra.mxu0 %v3780_v58  ;;  %v2379_v15 = vld [vmem:[%s5024_s15 + $0x18] sm:$0xff] }
 0xbaf   :  { %3782 = vmatprep.subr.bf16.mxu0 %v3863_v60  ;;  %v3783_v61 = vpack.c.bf16 %v2379_v15, %v2378_v26 }
 0xbb2   :  { %3784 = vmatpush3.bf16.msra.mxu0 %v3783_v61 }
 0xc50   :  { %v1786_v24 = vpop.f32.mrb[6].mxu0  ;;  %v1859_v62 = vpop.f32.mrb[6].mxu1 }
 0xc51   :  { %v1860_v0 = vadd.f32 %v1859_v62, %v1786_v24  ;;  %v3250_v1 = vpop.f32.mrb[7].mxu0  ;;  %v3269_v2 = vpop.f32.mrb[7].mxu1 }
 0xc60   :  { %v1942_v3 = vpop.f32.mrb[8].mxu0  ;;  %v2026_v37 = vpop.f32.mrb[8].mxu1 }
 0xc61   :  { %v1946_v5 = vadd.f32 %v1942_v3, %v1860_v0  ;;  %v3288_v6 = vpop.f32.mrb[9].mxu0  ;;  %v3307_v60 = vpop.f32.mrb[9].mxu1 }
 0xc63   :  { %v2030_v7 = vadd.f32 %v2026_v37, %v1946_v5 }
 0xc70   :  { %v2110_v8 = vpop.f32.mrb[10].mxu0  ;;  %v2194_v9 = vpop.f32.mrb[10].mxu1 }
 0xc71   :  { %v2114_v10 = vadd.f32 %v2110_v8, %v2030_v7  ;;  %v3326_v11 = vpop.f32.mrb[11].mxu0  ;;  %v3345_v12 = vpop.f32.mrb[11].mxu1 }
 0xc73   :  { %v2198_v13 = vadd.f32 %v2194_v9, %v2114_v10 }
 0xc80   :  { %v2278_v14 = vpop.f32.mrb[12].mxu0  ;;  %v2362_v16 = vpop.f32.mrb[12].mxu1 }
 0xc81   :  { %v2282_v18 = vadd.f32 %v2278_v14, %v2198_v13  ;;  %v3364_v19 = vpop.f32.mrb[13].mxu0  ;;  %v3383_v20 = vpop.f32.mrb[13].mxu1 }
 0xc83   :  { %v2366_v21 = vadd.f32 %v2362_v16, %v2282_v18 }
 0xc85   :  { %v2374_v59 = vadd.f32 %v2630_v4, %v2366_v21 }
 0xc87   :  { %v2375_v23 = vmax.f32 %v2374_v59, 0.0 }
 0xc89   :  { %3393 = vmatmul.mubr.msk.f32.vlgmr.msra.gmra.mrb[14].mxu0 %vm126_vm1, %v2375_v23 }
 0xd5c   :  { %v2456_v63 = vpop.f32.mrb[14].mxu0 }
 0xd5d   :  { %v2457_v28 = vadd.f32 %v2631_v27, %v2456_v63  ;;  %v3394_v25 = vpop.f32.mrb[15].mxu0 }
 0xd5f   :  { %v2461_v29 = vsel %vm2460_vm3, %v2457_v28, -inf }
 0xd60   :  { %2462 = vmax.xlane.f32.xlu0 %v2461_v29 }
 0xded   :  { %v2463_v30 = vpop.xlane.xlu0 %2462 }
 0xdee   :  { %v2464_v31 = vsub.f32 %v2457_v28, %v2463_v30 }
 0xdf0   :  { %v2465_v34 = vmul.f32 1.442695, %v2464_v31 }
 0xdf2   :  { %3826 = vpow2.f32 %v2465_v34 }
 0xdfc   :  { %v3827_v35 = vpop.eup %3826 }
 0xdfd   :  { %v2467_v36 = vsel %vm2460_vm3, %v3827_v35, 0.0 }
 0xdfe   :  { %2468 = vadd.xlane.f32.xlu1 %v2467_v36 }
 0xe8b   :  { %v2469_v38 = vpop.xlane.xlu1 %2468 }
 0xe8c   :  { %3828 = vlog2.f32 %v2469_v38 }
 0xe96   :  { %v3829_v22 = vpop.eup %3828 }
 0xe97   :  { %v2471_v39 = vmul.f32 0.6931472, %v3829_v22 }
 0xe99   :  { %v2472_v40 = vsub.f32 %v2464_v31, %v2471_v39 }
 0xe9b   :  { %2473 = vst.msk [vmem:[#allocation4] sm:$0x3] %vm2460_vm3, %v2472_v40 }
 0xe9c   :  { %3841 = shalt.err (!%p3838_p4)
}
 0xe9d   :  { %s3842_s22 = scalar_lea.hbm %s5026_s17, 32 }
 0xe9e   :  { %p3843_p5 = scmp.ne.s32.totalorder %s5026_s17, %s3842_s22  ;;  %p3846_p6 = scmp.lt.u32.totalorder %s3842_s22, %s5026_s17 }
 0xea0   :  { %p3848_p7 = pnand %p3846_p6, %p3843_p5 }
 0xea2   :  { %3851 = shalt.err (!%p3848_p7)
}
 0xea3   :  { %2483 = dma.vmem_to_hbm [thread:$0]  %s2481_s16, 32, %s5026_s17, [#allocation5]  }
 0xea4   :  { %3852 = dma.done.wait [#allocation5], 32  }
 0xea5   :  { %3853 = vsyncadd [#allocation5], 4294967264 }
 0xea6   :  { %2487 = vsyncpa [#allocation5], 1 }

</bundles_post_ra>
